<compile_context>
chip_gen: v6e
topology: v6e:2x2x1
jax: 0.10.0
libtpu: 0.0.40
codegen_flags: <defaults>
</compile_context>

<pallas_src>
import jax
import jax.numpy as jnp
from jax import lax
from jax.experimental import pallas as pl
from jax.experimental.pallas import tpu as pltpu


def _lstm_ln_kernel(x_ref, h_ref, c_ref, w_ih_ref, w_hh_ref, b_ref,
                    gamma_ref, beta_ref, h_out_ref, c_out_ref):
    H = c_ref.shape[-1]

    # Two accumulating MXU passes (same FLOPs as one fused K=(I+H) dot, but no
    # wrapper-side HBM concat): x @ W_ih^T + h @ W_hh^T, f32 accumulation.
    preact = jnp.dot(x_ref[...], w_ih_ref[...],
                     preferred_element_type=jnp.float32)
    preact = preact + jnp.dot(h_ref[...], w_hh_ref[...],
                              preferred_element_type=jnp.float32)
    preact = preact + b_ref[...].astype(jnp.float32)

    # One wide EUP pass over the (i, f, o) slab using
    # sigmoid(x) = 0.5*tanh(x/2) + 0.5 (1 EUP op/elem instead of exp + recip),
    # and one tanh over g. H is a multiple of 128 so all slices are lane-dense.
    gates = 0.5 * jnp.tanh(0.5 * preact[:, :3 * H]) + 0.5
    g_t = jnp.tanh(preact[:, 3 * H:])
    i_t = gates[:, 0 * H:1 * H]
    f_t = gates[:, 1 * H:2 * H]
    o_t = gates[:, 2 * H:3 * H]

    c_prev = c_ref[...].astype(jnp.float32)
    c_t = c_prev * f_t + i_t * g_t

    # LayerNorm over H (eps = 1e-5, torch default). Two-pass mean/variance:
    # matches PyTorch numerics and avoids the E[x^2]-E[x]^2 cancellation.
    inv_h = 1.0 / H
    mean = jnp.sum(c_t, axis=-1, keepdims=True) * inv_h
    centered = c_t - mean
    var = jnp.sum(centered * centered, axis=-1, keepdims=True) * inv_h
    c_ln = centered * lax.rsqrt(var + 1e-5)
    c_ln = (c_ln * gamma_ref[...].astype(jnp.float32)
            + beta_ref[...].astype(jnp.float32))

    h_t = o_t * jnp.tanh(c_ln)

    h_out_ref[...] = h_t.astype(h_out_ref.dtype)
    c_out_ref[...] = c_ln.astype(c_out_ref.dtype)


def _sublane_pack(*arrays):
    # Sublane packing: 8 rows for 4-byte dtypes, 16 for 2-byte, 32 for 1-byte.
    return max({4: 8, 2: 16, 1: 32}.get(a.dtype.itemsize, 8) for a in arrays)


def _pick_batch_tile(B, tb_req, pack):
    """Largest tile <= tb_req that divides B and is sublane-aligned (no padding)."""
    tb = B  # full-batch single block is always a legal BlockSpec
    for cand in range(pack, min(tb_req, B) + 1, pack):
        if B % cand == 0:
            tb = cand
    # v7x megacore: keep >= 2 batch tiles so the "parallel" axis spans both TCs.
    if tb == B and B >= 2 * pack and B % 2 == 0 and (B // 2) % pack == 0:
        tb = B // 2
    return tb


def _vmem_limit_bytes(tb, I, H, w_bytes, x_bytes, h_bytes, c_bytes):
    # Resident operands (weights + bias + LN params); x2 in case the pipeline
    # still allocates two buffers for them on this JAX version.
    resident = 2 * ((I + H) * 4 * H * w_bytes + 6 * H * 4)
    # Batch-tiled operands are double-buffered: x, h, c in; h_t, c_t out.
    tiles = 2 * tb * (I * x_bytes + H * h_bytes + H * c_bytes
                      + H * x_bytes + H * c_bytes)
    # f32 intermediates (preact 4H, gate slab 3H, c_t / LN temporaries).
    scratch = tb * 9 * H * 4
    total = resident + tiles + scratch
    # 1.5x headroom; clamp to [32 MiB, 64 MiB] (safe on v5e/v6e/v7x).
    return int(min(max(total * 1.5, 32 * 1024 * 1024), 64 * 1024 * 1024))


def lstm_cell_layer_norm(x, h, c, w_ih_t, w_hh_t, bias, gamma, beta, *, tb=256):
    """LayerNorm-LSTM cell forward.

    x:      (B, I)     input
    h, c:   (B, H)     previous output / cell state (keep c in float32)
    w_ih_t: (I, 4H)    ih weight, transposed vs PyTorch Linear
    w_hh_t: (H, 4H)    hh weight, transposed vs PyTorch Linear
    bias:   (1, 4H)    b_ih + b_hh pre-summed
    gamma:  (1, H)     LayerNorm weight
    beta:   (1, H)     LayerNorm bias
    tb:     requested batch tile (rows per grid step)
    Returns (h_t, c_t): h_t in x.dtype, c_t in c.dtype.
    """
    B, I = x.shape
    _, H = c.shape
    assert h.shape == (B, H) and c.shape == (B, H)
    assert w_ih_t.shape == (I, 4 * H) and w_hh_t.shape == (H, 4 * H)
    assert bias.shape == (1, 4 * H) and gamma.shape == (1, H) and beta.shape == (1, H)
    # H must be a multiple of 128 (lane width) so the 3H/1H gate slices and the
    # (tb, H) output stores stay lane-dense, unmasked vst.
    assert H % 128 == 0, "hidden_size must be a multiple of 128"

    pack = _sublane_pack(x, h, c)
    tb = _pick_batch_tile(B, tb, pack)
    grid = (B // tb,)

    batch_spec = lambda cols: pl.BlockSpec((tb, cols), lambda b: (b, 0))

    out_shape = (jax.ShapeDtypeStruct((B, H), x.dtype),   # h_t
                 jax.ShapeDtypeStruct((B, H), c.dtype))   # c_t stays in c dtype

    compiler_params = pltpu.CompilerParams(
        dimension_semantics=("parallel",),
        vmem_limit_bytes=_vmem_limit_bytes(
            tb, I, H,
            w_ih_t.dtype.itemsize, x.dtype.itemsize,
            h.dtype.itemsize, c.dtype.itemsize))

    def _call(single_buffer_residents):
        if single_buffer_residents:
            # Constant index_map keeps these VMEM-resident across all batch
            # tiles; Buffered(1) drops the useless second pipeline buffer
            # (halves the dominant weight VMEM footprint).
            res = lambda shp: pl.BlockSpec(shp, lambda b: (0, 0),
                                           pipeline_mode=pl.Buffered(1))
        else:
            res = lambda shp: pl.BlockSpec(shp, lambda b: (0, 0))
        return pl.pallas_call(
            _lstm_ln_kernel,
            out_shape=out_shape,
            grid=grid,
            in_specs=[
                batch_spec(I),          # x     : tiled on batch
                batch_spec(H),          # h     : tiled on batch
                batch_spec(H),          # c     : tiled on batch
                res((I, 4 * H)),        # W_ih^T: VMEM-resident across tiles
                res((H, 4 * H)),        # W_hh^T: VMEM-resident across tiles
                res((1, 4 * H)),        # bias
                res((1, H)),            # gamma
                res((1, H)),            # beta
            ],
            out_specs=(batch_spec(H), batch_spec(H)),
            compiler_params=compiler_params,
        )(x, h, c, w_ih_t, w_hh_t, bias, gamma, beta)

    try:
        return _call(single_buffer_residents=True)
    except Exception:
        # Graceful degradation if this JAX version rejects pipeline_mode /
        # Buffered(1) on a pallas_call BlockSpec; semantics are identical.
        return _call(single_buffer_residents=False)


def reference(x, h, c, w_ih_t, w_hh_t, bias, gamma, beta):
    H = c.shape[-1]
    preact = x @ w_ih_t + h @ w_hh_t + bias
    i_t = jax.nn.sigmoid(preact[:, :H])
    f_t = jax.nn.sigmoid(preact[:, H:2 * H])
    o_t = jax.nn.sigmoid(preact[:, 2 * H:3 * H])
    g_t = jnp.tanh(preact[:, 3 * H:])
    c_t = c * f_t + i_t * g_t
    mean = jnp.mean(c_t, axis=-1, keepdims=True)
    var = jnp.mean((c_t - mean) ** 2, axis=-1, keepdims=True)
    c_ln = (c_t - mean) * lax.rsqrt(var + 1e-5) * gamma + beta
    h_t = o_t * jnp.tanh(c_ln)
    return h_t, c_ln


if __name__ == "__main__":
    # Small, lane-aligned demo shapes: I = H = 128 (lane width), B = 32.
    # The default tb=256 clamps to 32 and is then split into two 16-row tiles,
    # exercising the batch grid (and both TensorCores on v7x).
    B, INPUT, HIDDEN = 32, 128, 128
    forget_bias = 0.0

    key = jax.random.PRNGKey(0)
    kx, kh, kc, kwi, kwh = jax.random.split(key, 5)

    x = jax.random.normal(kx, (B, INPUT), jnp.float32)
    h = jax.random.normal(kh, (B, HIDDEN), jnp.float32)
    c = jax.random.normal(kc, (B, HIDDEN), jnp.float32)

    # Weights stored transposed vs PyTorch Linear: (in_features, 4H).
    # (For production on v6e/v7x these can be bf16; the kernel accumulates f32.)
    w_ih_t = jax.random.normal(kwi, (INPUT, 4 * HIDDEN), jnp.float32) * 0.05
    w_hh_t = jax.random.normal(kwh, (HIDDEN, 4 * HIDDEN), jnp.float32) * 0.05

    # b_ih + b_hh pre-summed. PyTorch init: both zero except the forget segment
    # set to forget_bias in each -> 2 * forget_bias after summing.
    bias = jnp.zeros((1, 4 * HIDDEN), jnp.float32)
    bias = bias.at[0, HIDDEN:2 * HIDDEN].set(2.0 * forget_bias)

    gamma = jnp.ones((1, HIDDEN), jnp.float32)   # LayerNorm weight
    beta = jnp.zeros((1, HIDDEN), jnp.float32)   # LayerNorm bias

    h_t, c_t = lstm_cell_layer_norm(x, h, c, w_ih_t, w_hh_t, bias, gamma, beta)
    jax.block_until_ready((h_t, c_t))

    h_ref, c_ref = reference(x, h, c, w_ih_t, w_hh_t, bias, gamma, beta)
    assert jnp.allclose(h_t, h_ref, atol=1e-4, rtol=1e-4), "h_t mismatch"
    assert jnp.allclose(c_t, c_ref, atol=1e-4, rtol=1e-4), "c_t mismatch"

    print("KERNEL_OK")
</pallas_src>

<mosaic_0001>
module attributes {stable_mosaic.version = 11 : i64} {
  func.func @_lstm_ln_kernel(%arg0: i32, %arg1: memref<16x128xf32, #tpu.memory_space<vmem>>, %arg2: memref<16x128xf32, #tpu.memory_space<vmem>>, %arg3: memref<16x128xf32, #tpu.memory_space<vmem>>, %arg4: memref<128x512xf32, #tpu.memory_space<vmem>>, %arg5: memref<128x512xf32, #tpu.memory_space<vmem>>, %arg6: memref<1x512xf32, #tpu.memory_space<vmem>>, %arg7: memref<1x128xf32, #tpu.memory_space<vmem>>, %arg8: memref<1x128xf32, #tpu.memory_space<vmem>>, %arg9: memref<16x128xf32, #tpu.memory_space<vmem>>, %arg10: memref<16x128xf32, #tpu.memory_space<vmem>>) attributes {dimension_semantics = [#tpu.dimension_semantics<parallel>], iteration_bounds = array<i64: 2>, scalar_prefetch = 0 : i64, scratch_operands = 0 : i64, tpu.core_type = #tpu.core_type<tc>, window_params = [{transform_indices = @transform_0, window_bounds = array<i64: 16, 128>}, {transform_indices = @transform_1, window_bounds = array<i64: 16, 128>}, {transform_indices = @transform_2, window_bounds = array<i64: 16, 128>}, {pipeline_mode = #tpu.pipeline_mode<synchronous>, transform_indices = @transform_3, window_bounds = array<i64: 128, 512>}, {pipeline_mode = #tpu.pipeline_mode<synchronous>, transform_indices = @transform_4, window_bounds = array<i64: 128, 512>}, {pipeline_mode = #tpu.pipeline_mode<synchronous>, transform_indices = @transform_5, window_bounds = array<i64: 1, 512>}, {pipeline_mode = #tpu.pipeline_mode<synchronous>, transform_indices = @transform_6, window_bounds = array<i64: 1, 128>}, {pipeline_mode = #tpu.pipeline_mode<synchronous>, transform_indices = @transform_7, window_bounds = array<i64: 1, 128>}, {transform_indices = @transform_8, window_bounds = array<i64: 16, 128>}, {transform_indices = @transform_9, window_bounds = array<i64: 16, 128>}]} {
    %c0 = arith.constant 0 : index
    %c0_0 = arith.constant 0 : index
    %0 = vector.load %arg1[%c0, %c0_0] : memref<16x128xf32, #tpu.memory_space<vmem>>, vector<16x128xf32>
    %c0_1 = arith.constant 0 : index
    %c0_2 = arith.constant 0 : index
    %1 = vector.load %arg4[%c0_1, %c0_2] : memref<128x512xf32, #tpu.memory_space<vmem>>, vector<128x512xf32>
    %cst = arith.constant dense<0.000000e+00> : vector<16x512xf32>
    %2 = tpu.matmul %0, %1, %cst {dimension_numbers = #tpu.dot_dimension_numbers<[1], [0], [0], [1], [0, 0, 1, 1], [], []>} : vector<16x128xf32>, vector<128x512xf32>, vector<16x512xf32> -> vector<16x512xf32>
    %c0_3 = arith.constant 0 : index
    %c0_4 = arith.constant 0 : index
    %3 = vector.load %arg2[%c0_3, %c0_4] : memref<16x128xf32, #tpu.memory_space<vmem>>, vector<16x128xf32>
    %c0_5 = arith.constant 0 : index
    %c0_6 = arith.constant 0 : index
    %4 = vector.load %arg5[%c0_5, %c0_6] : memref<128x512xf32, #tpu.memory_space<vmem>>, vector<128x512xf32>
    %cst_7 = arith.constant dense<0.000000e+00> : vector<16x512xf32>
    %5 = tpu.matmul %3, %4, %cst_7 {dimension_numbers = #tpu.dot_dimension_numbers<[1], [0], [0], [1], [0, 0, 1, 1], [], []>} : vector<16x128xf32>, vector<128x512xf32>, vector<16x512xf32> -> vector<16x512xf32>
    %6 = arith.addf %2, %5 : vector<16x512xf32>
    %c0_8 = arith.constant 0 : index
    %c0_9 = arith.constant 0 : index
    %7 = vector.load %arg6[%c0_8, %c0_9] : memref<1x512xf32, #tpu.memory_space<vmem>>, vector<1x512xf32>
    %8 = vector.broadcast %7 : vector<1x512xf32> to vector<16x512xf32>
    %9 = arith.addf %6, %8 : vector<16x512xf32>
    %10 = vector.extract_strided_slice %9 {offsets = [0, 0], sizes = [16, 384], strides = [1, 1]} : vector<16x512xf32> to vector<16x384xf32>
    %cst_10 = arith.constant 5.000000e-01 : f32
    %11 = vector.broadcast %cst_10 : f32 to vector<16x384xf32>
    %12 = arith.mulf %11, %10 : vector<16x384xf32>
    %13 = math.tanh %12 : vector<16x384xf32>
    %cst_11 = arith.constant 5.000000e-01 : f32
    %14 = vector.broadcast %cst_11 : f32 to vector<16x384xf32>
    %15 = arith.mulf %14, %13 : vector<16x384xf32>
    %cst_12 = arith.constant 5.000000e-01 : f32
    %16 = vector.broadcast %cst_12 : f32 to vector<16x384xf32>
    %17 = arith.addf %15, %16 : vector<16x384xf32>
    %18 = vector.extract_strided_slice %9 {offsets = [0, 384], sizes = [16, 128], strides = [1, 1]} : vector<16x512xf32> to vector<16x128xf32>
    %19 = math.tanh %18 : vector<16x128xf32>
    %20 = vector.extract_strided_slice %17 {offsets = [0, 0], sizes = [16, 128], strides = [1, 1]} : vector<16x384xf32> to vector<16x128xf32>
    %21 = vector.extract_strided_slice %17 {offsets = [0, 128], sizes = [16, 128], strides = [1, 1]} : vector<16x384xf32> to vector<16x128xf32>
    %22 = vector.extract_strided_slice %17 {offsets = [0, 256], sizes = [16, 128], strides = [1, 1]} : vector<16x384xf32> to vector<16x128xf32>
    %c0_13 = arith.constant 0 : index
    %c0_14 = arith.constant 0 : index
    %23 = vector.load %arg3[%c0_13, %c0_14] : memref<16x128xf32, #tpu.memory_space<vmem>>, vector<16x128xf32>
    %24 = arith.mulf %23, %21 : vector<16x128xf32>
    %25 = arith.mulf %20, %19 : vector<16x128xf32>
    %26 = arith.addf %24, %25 : vector<16x128xf32>
    %cst_15 = arith.constant dense<0.000000e+00> : vector<16xf32>
    %27 = vector.multi_reduction <add>, %26, %cst_15 [1] : vector<16x128xf32> to vector<16xf32>
    %28 = vector.shape_cast %27 : vector<16xf32> to vector<16x1xf32>
    %cst_16 = arith.constant 7.812500e-03 : f32
    %29 = vector.broadcast %cst_16 : f32 to vector<16x1xf32>
    %30 = arith.mulf %28, %29 : vector<16x1xf32>
    %31 = vector.broadcast %30 : vector<16x1xf32> to vector<16x128xf32>
    %32 = arith.subf %26, %31 : vector<16x128xf32>
    %33 = arith.mulf %32, %32 : vector<16x128xf32>
    %cst_17 = arith.constant dense<0.000000e+00> : vector<16xf32>
    %34 = vector.multi_reduction <add>, %33, %cst_17 [1] : vector<16x128xf32> to vector<16xf32>
    %35 = vector.shape_cast %34 : vector<16xf32> to vector<16x1xf32>
    %cst_18 = arith.constant 7.812500e-03 : f32
    %36 = vector.broadcast %cst_18 : f32 to vector<16x1xf32>
    %37 = arith.mulf %35, %36 : vector<16x1xf32>
    %cst_19 = arith.constant 9.99999974E-6 : f32
    %38 = vector.broadcast %cst_19 : f32 to vector<16x1xf32>
    %39 = arith.addf %37, %38 : vector<16x1xf32>
    %40 = math.rsqrt %39 : vector<16x1xf32>
    %41 = vector.broadcast %40 : vector<16x1xf32> to vector<16x128xf32>
    %42 = arith.mulf %32, %41 : vector<16x128xf32>
    %c0_20 = arith.constant 0 : index
    %c0_21 = arith.constant 0 : index
    %43 = vector.load %arg7[%c0_20, %c0_21] : memref<1x128xf32, #tpu.memory_space<vmem>>, vector<1x128xf32>
    %44 = vector.broadcast %43 : vector<1x128xf32> to vector<16x128xf32>
    %45 = arith.mulf %42, %44 : vector<16x128xf32>
    %c0_22 = arith.constant 0 : index
    %c0_23 = arith.constant 0 : index
    %46 = vector.load %arg8[%c0_22, %c0_23] : memref<1x128xf32, #tpu.memory_space<vmem>>, vector<1x128xf32>
    %47 = vector.broadcast %46 : vector<1x128xf32> to vector<16x128xf32>
    %48 = arith.addf %45, %47 : vector<16x128xf32>
    %49 = math.tanh %48 : vector<16x128xf32>
    %50 = arith.mulf %22, %49 : vector<16x128xf32>
    %c0_24 = arith.constant 0 : index
    %c0_25 = arith.constant 0 : index
    %51 = vector.load %arg9[%c0_24, %c0_25] : memref<16x128xf32, #tpu.memory_space<vmem>>, vector<16x128xf32>
    tpu.vector_store %arg9[%c0_24, %c0_25], %50 {strides = array<i32>} : memref<16x128xf32, #tpu.memory_space<vmem>>, vector<16x128xf32>,
    %c0_26 = arith.constant 0 : index
    %c0_27 = arith.constant 0 : index
    %52 = vector.load %arg10[%c0_26, %c0_27] : memref<16x128xf32, #tpu.memory_space<vmem>>, vector<16x128xf32>
    tpu.vector_store %arg10[%c0_26, %c0_27], %48 {strides = array<i32>} : memref<16x128xf32, #tpu.memory_space<vmem>>, vector<16x128xf32>,
    return
  }
  func.func @transform_0(%arg0: i32) -> (i32, i32) {
    %c0_i32 = arith.constant 0 : i32
    %c0_i32_0 = arith.constant 0 : i32
    return %arg0, %c0_i32 : i32, i32
  }
  func.func @transform_1(%arg0: i32) -> (i32, i32) {
    %c0_i32 = arith.constant 0 : i32
    %c0_i32_0 = arith.constant 0 : i32
    return %arg0, %c0_i32 : i32, i32
  }
  func.func @transform_2(%arg0: i32) -> (i32, i32) {
    %c0_i32 = arith.constant 0 : i32
    %c0_i32_0 = arith.constant 0 : i32
    return %arg0, %c0_i32 : i32, i32
  }
  func.func @transform_3(%arg0: i32) -> (i32, i32) {
    %c0_i32 = arith.constant 0 : i32
    %c0_i32_0 = arith.constant 0 : i32
    %c0_i32_1 = arith.constant 0 : i32
    return %c0_i32, %c0_i32_0 : i32, i32
  }
  func.func @transform_4(%arg0: i32) -> (i32, i32) {
    %c0_i32 = arith.constant 0 : i32
    %c0_i32_0 = arith.constant 0 : i32
    %c0_i32_1 = arith.constant 0 : i32
    return %c0_i32, %c0_i32_0 : i32, i32
  }
  func.func @transform_5(%arg0: i32) -> (i32, i32) {
    %c0_i32 = arith.constant 0 : i32
    %c0_i32_0 = arith.constant 0 : i32
    %c0_i32_1 = arith.constant 0 : i32
    return %c0_i32, %c0_i32_0 : i32, i32
  }
  func.func @transform_6(%arg0: i32) -> (i32, i32) {
    %c0_i32 = arith.constant 0 : i32
    %c0_i32_0 = arith.constant 0 : i32
    %c0_i32_1 = arith.constant 0 : i32
    return %c0_i32, %c0_i32_0 : i32, i32
  }
  func.func @transform_7(%arg0: i32) -> (i32, i32) {
    %c0_i32 = arith.constant 0 : i32
    %c0_i32_0 = arith.constant 0 : i32
    %c0_i32_1 = arith.constant 0 : i32
    return %c0_i32, %c0_i32_0 : i32, i32
  }
  func.func @transform_8(%arg0: i32) -> (i32, i32) {
    %c0_i32 = arith.constant 0 : i32
    %c0_i32_0 = arith.constant 0 : i32
    return %arg0, %c0_i32 : i32, i32
  }
  func.func @transform_9(%arg0: i32) -> (i32, i32) {
    %c0_i32 = arith.constant 0 : i32
    %c0_i32_0 = arith.constant 0 : i32
    return %arg0, %c0_i32 : i32, i32
  }
}

module attributes {stable_mosaic.version = 11 : i64} {
  func.func @_lstm_ln_kernel(%arg0: i32, %arg1: memref<16x128xf32, #tpu.memory_space<vmem>>, %arg2: memref<16x128xf32, #tpu.memory_space<vmem>>, %arg3: memref<16x128xf32, #tpu.memory_space<vmem>>, %arg4: memref<128x512xf32, #tpu.memory_space<vmem>>, %arg5: memref<128x512xf32, #tpu.memory_space<vmem>>, %arg6: memref<1x512xf32, #tpu.memory_space<vmem>>, %arg7: memref<1x128xf32, #tpu.memory_space<vmem>>, %arg8: memref<1x128xf32, #tpu.memory_space<vmem>>, %arg9: memref<16x128xf32, #tpu.memory_space<vmem>>, %arg10: memref<16x128xf32, #tpu.memory_space<vmem>>) attributes {dimension_semantics = [#tpu.dimension_semantics<parallel>], iteration_bounds = array<i64: 2>, scalar_prefetch = 0 : i64, scratch_operands = 0 : i64, tpu.core_type = #tpu.core_type<tc>, window_params = [{transform_indices = @transform_0, window_bounds = array<i64: 16, 128>}, {transform_indices = @transform_1, window_bounds = array<i64: 16, 128>}, {transform_indices = @transform_2, window_bounds = array<i64: 16, 128>}, {pipeline_mode = #tpu.pipeline_mode<synchronous>, transform_indices = @transform_3, window_bounds = array<i64: 128, 512>}, {pipeline_mode = #tpu.pipeline_mode<synchronous>, transform_indices = @transform_4, window_bounds = array<i64: 128, 512>}, {pipeline_mode = #tpu.pipeline_mode<synchronous>, transform_indices = @transform_5, window_bounds = array<i64: 1, 512>}, {pipeline_mode = #tpu.pipeline_mode<synchronous>, transform_indices = @transform_6, window_bounds = array<i64: 1, 128>}, {pipeline_mode = #tpu.pipeline_mode<synchronous>, transform_indices = @transform_7, window_bounds = array<i64: 1, 128>}, {transform_indices = @transform_8, window_bounds = array<i64: 16, 128>}, {transform_indices = @transform_9, window_bounds = array<i64: 16, 128>}]} {
    %c0 = arith.constant 0 : index
    %c0_0 = arith.constant 0 : index
    %0 = vector.load %arg1[%c0, %c0_0] : memref<16x128xf32, #tpu.memory_space<vmem>>, vector<16x128xf32>
    %c0_1 = arith.constant 0 : index
    %c0_2 = arith.constant 0 : index
    %1 = vector.load %arg4[%c0_1, %c0_2] : memref<128x512xf32, #tpu.memory_space<vmem>>, vector<128x512xf32>
    %cst = arith.constant dense<0.000000e+00> : vector<16x512xf32>
    %2 = tpu.matmul %0, %1, %cst {dimension_numbers = #tpu.dot_dimension_numbers<[1], [0], [0], [1], [0, 0, 1, 1], [], []>} : vector<16x128xf32>, vector<128x512xf32>, vector<16x512xf32> -> vector<16x512xf32>
    %c0_3 = arith.constant 0 : index
    %c0_4 = arith.constant 0 : index
    %3 = vector.load %arg2[%c0_3, %c0_4] : memref<16x128xf32, #tpu.memory_space<vmem>>, vector<16x128xf32>
    %c0_5 = arith.constant 0 : index
    %c0_6 = arith.constant 0 : index
    %4 = vector.load %arg5[%c0_5, %c0_6] : memref<128x512xf32, #tpu.memory_space<vmem>>, vector<128x512xf32>
    %cst_7 = arith.constant dense<0.000000e+00> : vector<16x512xf32>
    %5 = tpu.matmul %3, %4, %cst_7 {dimension_numbers = #tpu.dot_dimension_numbers<[1], [0], [0], [1], [0, 0, 1, 1], [], []>} : vector<16x128xf32>, vector<128x512xf32>, vector<16x512xf32> -> vector<16x512xf32>
    %6 = arith.addf %2, %5 : vector<16x512xf32>
    %c0_8 = arith.constant 0 : index
    %c0_9 = arith.constant 0 : index
    %7 = vector.load %arg6[%c0_8, %c0_9] : memref<1x512xf32, #tpu.memory_space<vmem>>, vector<1x512xf32>
    %8 = vector.broadcast %7 : vector<1x512xf32> to vector<16x512xf32>
    %9 = arith.addf %6, %8 : vector<16x512xf32>
    %10 = vector.extract_strided_slice %9 {offsets = [0, 0], sizes = [16, 384], strides = [1, 1]} : vector<16x512xf32> to vector<16x384xf32>
    %cst_10 = arith.constant 5.000000e-01 : f32
    %11 = vector.broadcast %cst_10 : f32 to vector<16x384xf32>
    %12 = arith.mulf %11, %10 : vector<16x384xf32>
    %13 = math.tanh %12 : vector<16x384xf32>
    %cst_11 = arith.constant 5.000000e-01 : f32
    %14 = vector.broadcast %cst_11 : f32 to vector<16x384xf32>
    %15 = arith.mulf %14, %13 : vector<16x384xf32>
    %cst_12 = arith.constant 5.000000e-01 : f32
    %16 = vector.broadcast %cst_12 : f32 to vector<16x384xf32>
    %17 = arith.addf %15, %16 : vector<16x384xf32>
    %18 = vector.extract_strided_slice %9 {offsets = [0, 384], sizes = [16, 128], strides = [1, 1]} : vector<16x512xf32> to vector<16x128xf32>
    %19 = math.tanh %18 : vector<16x128xf32>
    %20 = vector.extract_strided_slice %17 {offsets = [0, 0], sizes = [16, 128], strides = [1, 1]} : vector<16x384xf32> to vector<16x128xf32>
    %21 = vector.extract_strided_slice %17 {offsets = [0, 128], sizes = [16, 128], strides = [1, 1]} : vector<16x384xf32> to vector<16x128xf32>
    %22 = vector.extract_strided_slice %17 {offsets = [0, 256], sizes = [16, 128], strides = [1, 1]} : vector<16x384xf32> to vector<16x128xf32>
    %c0_13 = arith.constant 0 : index
    %c0_14 = arith.constant 0 : index
    %23 = vector.load %arg3[%c0_13, %c0_14] : memref<16x128xf32, #tpu.memory_space<vmem>>, vector<16x128xf32>
    %24 = arith.mulf %23, %21 : vector<16x128xf32>
    %25 = arith.mulf %20, %19 : vector<16x128xf32>
    %26 = arith.addf %24, %25 : vector<16x128xf32>
    %cst_15 = arith.constant dense<0.000000e+00> : vector<16xf32>
    %27 = vector.multi_reduction <add>, %26, %cst_15 [1] : vector<16x128xf32> to vector<16xf32>
    %28 = vector.shape_cast %27 : vector<16xf32> to vector<16x1xf32>
    %cst_16 = arith.constant 7.812500e-03 : f32
    %29 = vector.broadcast %cst_16 : f32 to vector<16x1xf32>
    %30 = arith.mulf %28, %29 : vector<16x1xf32>
    %31 = vector.broadcast %30 : vector<16x1xf32> to vector<16x128xf32>
    %32 = arith.subf %26, %31 : vector<16x128xf32>
    %33 = arith.mulf %32, %32 : vector<16x128xf32>
    %cst_17 = arith.constant dense<0.000000e+00> : vector<16xf32>
    %34 = vector.multi_reduction <add>, %33, %cst_17 [1] : vector<16x128xf32> to vector<16xf32>
    %35 = vector.shape_cast %34 : vector<16xf32> to vector<16x1xf32>
    %cst_18 = arith.constant 7.812500e-03 : f32
    %36 = vector.broadcast %cst_18 : f32 to vector<16x1xf32>
    %37 = arith.mulf %35, %36 : vector<16x1xf32>
    %cst_19 = arith.constant 9.99999974E-6 : f32
    %38 = vector.broadcast %cst_19 : f32 to vector<16x1xf32>
    %39 = arith.addf %37, %38 : vector<16x1xf32>
    %40 = math.rsqrt %39 : vector<16x1xf32>
    %41 = vector.broadcast %40 : vector<16x1xf32> to vector<16x128xf32>
    %42 = arith.mulf %32, %41 : vector<16x128xf32>
    %c0_20 = arith.constant 0 : index
    %c0_21 = arith.constant 0 : index
    %43 = vector.load %arg7[%c0_20, %c0_21] : memref<1x128xf32, #tpu.memory_space<vmem>>, vector<1x128xf32>
    %44 = vector.broadcast %43 : vector<1x128xf32> to vector<16x128xf32>
    %45 = arith.mulf %42, %44 : vector<16x128xf32>
    %c0_22 = arith.constant 0 : index
    %c0_23 = arith.constant 0 : index
    %46 = vector.load %arg8[%c0_22, %c0_23] : memref<1x128xf32, #tpu.memory_space<vmem>>, vector<1x128xf32>
    %47 = vector.broadcast %46 : vector<1x128xf32> to vector<16x128xf32>
    %48 = arith.addf %45, %47 : vector<16x128xf32>
    %49 = math.tanh %48 : vector<16x128xf32>
    %50 = arith.mulf %22, %49 : vector<16x128xf32>
    %c0_24 = arith.constant 0 : index
    %c0_25 = arith.constant 0 : index
    %51 = vector.load %arg9[%c0_24, %c0_25] : memref<16x128xf32, #tpu.memory_space<vmem>>, vector<16x128xf32>
    tpu.vector_store %arg9[%c0_24, %c0_25], %50 {strides = array<i32>} : memref<16x128xf32, #tpu.memory_space<vmem>>, vector<16x128xf32>,
    %c0_26 = arith.constant 0 : index
    %c0_27 = arith.constant 0 : index
    %52 = vector.load %arg10[%c0_26, %c0_27] : memref<16x128xf32, #tpu.memory_space<vmem>>, vector<16x128xf32>
    tpu.vector_store %arg10[%c0_26, %c0_27], %48 {strides = array<i32>} : memref<16x128xf32, #tpu.memory_space<vmem>>, vector<16x128xf32>,
    return
  }
  func.func @transform_0(%arg0: i32) -> (i32, i32) {
    %c0_i32 = arith.constant 0 : i32
    %c0_i32_0 = arith.constant 0 : i32
    return %arg0, %c0_i32 : i32, i32
  }
  func.func @transform_1(%arg0: i32) -> (i32, i32) {
    %c0_i32 = arith.constant 0 : i32
    %c0_i32_0 = arith.constant 0 : i32
    return %arg0, %c0_i32 : i32, i32
  }
  func.func @transform_2(%arg0: i32) -> (i32, i32) {
    %c0_i32 = arith.constant 0 : i32
    %c0_i32_0 = arith.constant 0 : i32
    return %arg0, %c0_i32 : i32, i32
  }
  func.func @transform_3(%arg0: i32) -> (i32, i32) {
    %c0_i32 = arith.constant 0 : i32
    %c0_i32_0 = arith.constant 0 : i32
    %c0_i32_1 = arith.constant 0 : i32
    return %c0_i32, %c0_i32_0 : i32, i32
  }
  func.func @transform_4(%arg0: i32) -> (i32, i32) {
    %c0_i32 = arith.constant 0 : i32
    %c0_i32_0 = arith.constant 0 : i32
    %c0_i32_1 = arith.constant 0 : i32
    return %c0_i32, %c0_i32_0 : i32, i32
  }
  func.func @transform_5(%arg0: i32) -> (i32, i32) {
    %c0_i32 = arith.constant 0 : i32
    %c0_i32_0 = arith.constant 0 : i32
    %c0_i32_1 = arith.constant 0 : i32
    return %c0_i32, %c0_i32_0 : i32, i32
  }
  func.func @transform_6(%arg0: i32) -> (i32, i32) {
    %c0_i32 = arith.constant 0 : i32
    %c0_i32_0 = arith.constant 0 : i32
    %c0_i32_1 = arith.constant 0 : i32
    return %c0_i32, %c0_i32_0 : i32, i32
  }
  func.func @transform_7(%arg0: i32) -> (i32, i32) {
    %c0_i32 = arith.constant 0 : i32
    %c0_i32_0 = arith.constant 0 : i32
    %c0_i32_1 = arith.constant 0 : i32
    return %c0_i32, %c0_i32_0 : i32, i32
  }
  func.func @transform_8(%arg0: i32) -> (i32, i32) {
    %c0_i32 = arith.constant 0 : i32
    %c0_i32_0 = arith.constant 0 : i32
    return %arg0, %c0_i32 : i32, i32
  }
  func.func @transform_9(%arg0: i32) -> (i32, i32) {
    %c0_i32 = arith.constant 0 : i32
    %c0_i32_0 = arith.constant 0 : i32
    return %arg0, %c0_i32 : i32, i32
  }
}

</mosaic_0001>

<bundles_post_ra>
// kernel: tpu_custom_call.1
= control target key start
LH: loop header
LB: loop body
LE: loop exit
PB: predicated region body
PF: predicated region fallthrough
CT: control target
= control target key end

     0   :  { %s2044_s0 = inlined_call_operand.hbm [shape: f32[32,128], index: 0, kind: input, shape index: {}]   ;;  %s2045_s1 = inlined_call_operand.hbm [shape: f32[32,128], index: 1, kind: input, shape index: {}]   ;;  %s2046_s2 = inlined_call_operand.hbm [shape: f32[32,128], index: 2, kind: input, shape index: {}]   ;;  %s2047_s3 = inlined_call_operand.hbm [shape: f32[128,512], index: 3, kind: input, shape index: {}]   ;;  %s2048_s4 = inlined_call_operand.hbm [shape: f32[128,512], index: 4, kind: input, shape index: {}]   ;;  %s2049_s5 = inlined_call_operand.vmem [shape: f32[1,512], index: 5, kind: input, shape index: {}]   ;;  %s2050_s6 = inlined_call_operand.vmem [shape: f32[1,128], index: 6, kind: input, shape index: {}]   ;;  %s2051_s7 = inlined_call_operand.vmem [shape: f32[1,128], index: 7, kind: input, shape index: {}]   ;;  %s2052_s8 = inlined_call_operand.hbm [shape: f32[32,128], index: 8, kind: output, shape index: {0}]   ;;  %s2053_s9 = inlined_call_operand.hbm [shape: f32[32,128], index: 9, kind: output, shape index: {1}]  }
   0x1   :  { %2073 = sst [smem:[#allocation24_spill]] %s2044_s0 }
   0x2   :  { %2074 = sst [smem:[#allocation25_spill]] %s2045_s1 }
   0x3   :  { %2075 = sst [smem:[#allocation26_spill]] %s2047_s3 }
   0x4   :  { %15 = vsyncpa [#allocation3], 0 }
   0x5   :  { %17 = vsyncpa [#allocation3 + $0x1], 0 }
   0x6   :  { %18 = vsyncpa [#allocation6], 0 }
   0x7   :  { %20 = vsyncpa [#allocation6 + $0x1], 0 }
   0x8   :  { %21 = vsyncpa [#allocation9], 0 }
   0x9   :  { %22 = vsyncpa [#allocation4], 0 }
   0xa   :  { %24 = vsyncpa [#allocation4 + $0x1], 0 }
   0xb   :  { %25 = vsyncpa [#allocation13], 0 }
   0xc   :  { %27 = vsyncpa [#allocation13 + $0x1], 0  ;;  %s1681_s30 = smov 0   ;;  %s1683_s10 = smov 0  }
   0xd   :  { %s1685_s11 = smov 0   ;;  %s1687_s12 = smov 0  }
   0xe LB: > { %2076 = sst [smem:[#allocation19_spill]] %s1603_s30  ;;  %s1702_s13 = sadd.s32 4294967295, %s1615_s12   ;;  %s1615_s12 = sphi %s1687_s12, %s2109_s12   ;;  %s1611_s11 = sphi %s1685_s11, %s2113_s11   ;;  %s1607_s10 = sphi %s1683_s10, %s2112_s10   ;;  %s1603_s30 = sphi %s1681_s30, %s2111_s30  }
   0xf   : > { %2077 = sst [smem:[#allocation20_spill]] %s1615_s12  ;;  %s1227_s14 = sadd.s32 4294967294, %s1615_s12  }
  0x10   : > { %s1706_s15 = sadd.s32 1, %s1615_s12   ;;  %s40_s16 = sadd.s32 1, %s1611_s11 }
  0x11   : > { %2078 = sst [smem:[#allocation21_spill]] %s1706_s15  ;;  %s37_s17 = ssub.s32 %s1615_s12, %s1706_s15 }
  0x12   : > { %p47_p0 = scmp.ne.s32.totalorder %s1611_s11, %s1607_s10  ;;  %p38_p1 = scmp.eq.s32.totalorder %s37_s17, 0 }
  0x13   : > { %p48_p2 = scmp.eq.s32.totalorder %s1615_s12, 0  ;;  %p53_p3 = scmp.ne.s32.totalorder %s1607_s10, %s1603_s30 }
  0x14   : > { %p2054_p4 = scmp.eq.s32.totalorder %s1702_s13, 0  ;;  %p234_p7 = scmp.eq.s32.totalorder %s1702_s13, 1 }
  0x15   : > { %s1718_s18 = scalar_select %p38_p1, %s1611_s11, %s40_s16  }
  0x16   : > { %p1720_p5 = por %p48_p2, %p47_p0  ;;  %p1726_p6 = por %p2054_p4, %p53_p3 }
  0x17   : > { %2079 = sst [smem:[#allocation22_spill]] %s1718_s18  ;;  %p240_p8 = scmp.eq.s32.totalorder %s1227_s14, 1 }
  0x18   : > { %s2081_s20 = scalar_select %p1726_p6, 1, 0 }
  0x19   : > { %p1228_p9 = scmp.ge.s32.totalorder %s1615_s12, 1  ;;  %p273_p10 = scmp.lt.s32.totalorder %s1615_s12, 3 }
  0x1a   : > { %p1733_p11 = por %p234_p7, %p47_p0  ;;  %p1737_p12 = por %p240_p8, %p53_p3 }
  0x1b   : > { %p1741_p13 = pnand %p1228_p9, %p273_p10  ;;  %s1617_s24 = smov [#allocation8]  }
  0x1c   : > { %s2082_s21 = scalar_select %p1733_p11, 1, 0 }
  0x1d   : > { %s2083_s22 = scalar_select %p1737_p12, 1, 0 }
  0x1e   : > { %s2085_s23 = scalar_select %p1741_p13, 1, 0 }
  0x1f   : > { %2084 = sst [smem:[#allocation23_spill]] %s2083_s22  ;;  %p1282_p1 = pneg %p1741_p13 }
  0x20   : > { %s285_s25 = sshll.u32 %s1617_s24, 4  ;;  %p1308_p3 = scmp.lt.s32.totalorder %s1615_s12, 2  ;;  %s286_s25 = int_to_ptr.vmem [resolvable:$true] %s285_s25 }
  0x21   : > { %p1749_p2 = pnand %p1282_p1, %p2054_p4  ;;  %s2056_s27 = sand.u32 1, %s1611_s11  }
  0x22   : > { %s1758_s28 = sshll.u32 %s2056_s27, 4  ;;  %s1388_s29 = scalar_lea.vmem %s286_s25, 8192 }
  0x23   : > { %s2086_s26 = scalar_select %p1749_p2, 1, 0 }
  0x24   : > { %p2064_p7 = pneg %p1749_p2  ;;  %p1389_p8 = scmp.ne.s32.totalorder %s286_s25, %s1388_s29 }
  0x25   : > { %p1396_p1 = scmp.lt.s32.totalorder %s286_s25, %s286_s25  ;;  %p1397_p4 = scmp.lt.s32.totalorder %s1388_s29, %s1388_s29 }
  0x26   : > { %p1391_p9 = pnand %p1389_p8, %p2064_p7 }
  0x27   : > { %p1398_p12 = por %p1397_p4, %p1396_p1 }
  0x28   : > { %p1392_p10 = pneg %p1391_p9 }
  0x2a   : > { %p1399_p11 = pnand %p1398_p12, %p1392_p10 }
  0x2c   : > { %1402 = shalt.err (!%p1399_p11)
}
  0x2d   : > { %s2061_s14 = smov 512   ;;  %s2062_s16 = smov 32  }
  0x2e   : > { %s2087_s3 = sld [smem:[#allocation26_spill]]  ;;  %s1774_s29 = sshll.u32 %s1615_s12, 8 }
  0x2f   : > { %p1780_p4 = pnand %p1308_p3, %p1720_p5  ;;  %s342_s18 = sand.u32 1, %s1615_s12  }
  0x30   : > { %s2089_s1 = sld [smem:[#allocation25_spill]]  ;;  %s1794_s19 = scalar_lea.sflag [#allocation6], %s342_s18 }
  0x31   : > { %p1800_p11 = pneg %p1780_p4 }
  0x34   : > { %1285 = dma.hbm_to_vmem [thread:$0]  (!%p1749_p2), %s2087_s3, 8192, %s286_s25, [#allocation9], %s2061_s14, %s2061_s14, %s2062_s16  }
  0x35   : > { %s346_s25 = scalar_lea.vmem [#allocation5], %s1758_s28 }
  0x36   : > { %s1789_s30 = scalar_lea.hbm %s2089_s1, %s1774_s29  ;;  %s353_s17 = sshll.u32 %s346_s25, 4  ;;  %s1792_s17 = int_to_ptr.vmem [resolvable:$true] %s353_s17 }
  0x37   : > { %s1403_s24 = scalar_lea.hbm %s1789_s30, 256  ;;  %s1408_s16 = scalar_lea.hbm %s2089_s1, 512 }
  0x38   : > { %p1404_p5 = scmp.ne.s32.totalorder %s1789_s30, %s1403_s24  ;;  %p1409_p8 = scmp.lt.s32.totalorder %s1789_s30, %s2089_s1 }
  0x39   : > { %p1410_p9 = scmp.lt.s32.totalorder %s1408_s16, %s1403_s24 }
  0x3a   : > { %p1406_p12 = pnand %p1800_p11, %p1404_p5 }
  0x3b   : > { %p1411_p10 = por %p1410_p9, %p1409_p8 }
  0x3c   : > { %p1407_p3 = pneg %p1406_p12 }
  0x3e   : > { %p1412_p1 = pnand %p1411_p10, %p1407_p3 }
  0x40   : > { %1415 = shalt.err (!%p1412_p1)
}
  0x41   : > { %s1416_s18 = scalar_lea.vmem %s1792_s17, 256  ;;  %s1620_s12 = smov [#allocation5]  }
  0x42   : > { %p1417_p0 = scmp.ne.s32.totalorder %s1792_s17, %s1416_s18  ;;  %s1421_s15 = sshll.u32 %s1620_s12, 4  ;;  %s1422_s15 = int_to_ptr.vmem [resolvable:$false] %s1421_s15 }
  0x43   : > { %s1423_s22 = scalar_lea.vmem %s1422_s15, 512  ;;  %p1424_p7 = scmp.lt.s32.totalorder %s1792_s17, %s1422_s15 }
  0x44   : > { %p1419_p5 = pnand %p1417_p0, %p1800_p11  ;;  %p1425_p6 = scmp.lt.s32.totalorder %s1423_s22, %s1416_s18 }
  0x46   : > { %p1420_p12 = pneg %p1419_p5  ;;  %p1426_p13 = por %p1425_p6, %p1424_p7 }
  0x48   : > { %p1427_p2 = pnand %p1426_p13, %p1420_p12 }
  0x4a   : > { %1430 = shalt.err (!%p1427_p2)
}
  0x4b   : > { %s2069_s3 = smov 128   ;;  %s2071_s16 = smov 8  }
  0x4c   : > { %1295 = dma.hbm_to_vmem [thread:$0]  (!%p1780_p4), %s1789_s30, 256, %s1792_s17, %s1794_s19, %s2069_s3, %s2069_s3, %s2071_s16  }
  0x4d   : > { %s1623_s12 = smov [#allocation10]   ;;  %p2091_p6 = scmp.ne.s32.totalorder %s2086_s26, 0 }
  0x4e   : > { %s298_s24 = sshll.u32 %s1623_s12, 4  ;;  %s299_s24 = int_to_ptr.vmem [resolvable:$true] %s298_s24 }
  0x4f   : > { %s1442_s25 = scalar_lea.vmem %s299_s24, 8192  ;;  %p2092_p13 = pneg %p2091_p6 }
  0x50   : > { %p1443_p0 = scmp.ne.s32.totalorder %s299_s24, %s1442_s25  ;;  %p1450_p3 = scmp.lt.s32.totalorder %s299_s24, %s299_s24 }
  0x51   : > { %p1451_p8 = scmp.lt.s32.totalorder %s1442_s25, %s1442_s25 }
  0x52   : > { %p1445_p2 = pnand %p1443_p0, %p2092_p13 }
  0x53   : > { %p1452_p9 = por %p1451_p8, %p1450_p3 }
  0x54   : > { %p1446_p7 = pneg %p1445_p2 }
  0x56   : > { %p1453_p10 = pnand %p1452_p9, %p1446_p7 }
  0x58   : > { %1456 = shalt.err (!%p1453_p10)
}
  0x59   : > { %s2093_s18 = smov 32   ;;  %s2094_s15 = smov 512  }
  0x5a   : > { %1288 = dma.hbm_to_vmem [thread:$0]  (!%p2091_p6), %s2048_s4, 8192, %s299_s24, [#allocation9], %s2094_s15, %s2094_s15, %s2093_s18  }
  0x5b   : > { %s2095_s0 = sld [smem:[#allocation24_spill]]  ;;  %s325_s26 = scalar_lea.vmem [#allocation2], %s1758_s28 }
  0x5c   : > { %s332_s3 = sshll.u32 %s325_s26, 4  ;;  %s2096_s16 = sand.u32 1, %s1611_s11   ;;  %s1844_s3 = int_to_ptr.vmem [resolvable:$true] %s332_s3 }
  0x5d   : > { %s322_s1 = scalar_lea.sflag [#allocation3], %s2096_s16 }
  0x61   : > { %s1841_s25 = scalar_lea.hbm %s2095_s0, %s1774_s29  ;;  %s1462_s15 = scalar_lea.hbm %s2095_s0, 512 }
  0x62   : > { %s1457_s30 = scalar_lea.hbm %s1841_s25, 256  ;;  %p1463_p0 = scmp.lt.s32.totalorder %s1841_s25, %s2095_s0 }
  0x63   : > { %p1458_p1 = scmp.ne.s32.totalorder %s1841_s25, %s1457_s30  ;;  %p1464_p6 = scmp.lt.s32.totalorder %s1462_s15, %s1457_s30 }
  0x65   : > { %p1460_p5 = pnand %p1458_p1, %p1800_p11  ;;  %p1465_p13 = por %p1464_p6, %p1463_p0 }
  0x67   : > { %p1461_p12 = pneg %p1460_p5 }
  0x69   : > { %p1466_p2 = pnand %p1465_p13, %p1461_p12 }
  0x6b   : > { %1469 = shalt.err (!%p1466_p2)
}
  0x6c   : > { %s1470_s16 = scalar_lea.vmem %s1844_s3, 256  ;;  %s1624_s12 = smov [#allocation2]  }
  0x6d   : > { %p1471_p7 = scmp.ne.s32.totalorder %s1844_s3, %s1470_s16  ;;  %s1475_s26 = sshll.u32 %s1624_s12, 4  ;;  %s1476_s26 = int_to_ptr.vmem [resolvable:$false] %s1475_s26 }
  0x6e   : > { %s1477_s24 = scalar_lea.vmem %s1476_s26, 512  ;;  %p1478_p9 = scmp.lt.s32.totalorder %s1844_s3, %s1476_s26 }
  0x6f   : > { %p1473_p3 = pnand %p1471_p7, %p1800_p11  ;;  %p1479_p10 = scmp.lt.s32.totalorder %s1477_s24, %s1470_s16 }
  0x71   : > { %p1474_p8 = pneg %p1473_p3  ;;  %p1480_p1 = por %p1479_p10, %p1478_p9 }
  0x73   : > { %p1481_p5 = pnand %p1480_p1, %p1474_p8 }
  0x75   : > { %1484 = shalt.err (!%p1481_p5)
}
  0x76   : > { %s2097_s30 = smov 8   ;;  %s2098_s18 = smov 128  }
  0x77   : > { %1292 = dma.hbm_to_vmem [thread:$0]  (!%p1780_p4), %s1841_s25, 256, %s1844_s3, %s322_s1, %s2098_s18, %s2098_s18, %s2097_s30  }
  0x78   : > { %s1875_s22 = scalar_lea.hbm %s2046_s2, %s1774_s29  ;;  %s367_s16 = scalar_lea.vmem [#allocation7], %s1758_s28 }
  0x79   : > { %s374_s12 = sshll.u32 %s367_s16, 4  ;;  %s1485_s26 = scalar_lea.hbm %s1875_s22, 256  ;;  %s375_s12 = int_to_ptr.vmem [resolvable:$true] %s374_s12 }
  0x7a   : > { %p1486_p12 = scmp.ne.s32.totalorder %s1875_s22, %s1485_s26  ;;  %s1490_s1 = scalar_lea.hbm %s2046_s2, 512 }
  0x7b   : > { %p1491_p13 = scmp.lt.s32.totalorder %s1875_s22, %s2046_s2  ;;  %p1492_p2 = scmp.lt.s32.totalorder %s1490_s1, %s1485_s26 }
  0x7c   : > { %p1488_p0 = pnand %p1486_p12, %p1800_p11 }
  0x7d   : > { %p1493_p7 = por %p1492_p2, %p1491_p13 }
  0x7e   : > { %p1489_p6 = pneg %p1488_p0 }
  0x80   : > { %p1494_p3 = pnand %p1493_p7, %p1489_p6 }
  0x82   : > { %1497 = shalt.err (!%p1494_p3)
}
  0x83   : > { %s1498_s28 = scalar_lea.vmem %s375_s12, 256  ;;  %s1625_s29 = smov [#allocation7]  }
  0x84   : > { %p1499_p8 = scmp.ne.s32.totalorder %s375_s12, %s1498_s28  ;;  %s1503_s15 = sshll.u32 %s1625_s29, 4  ;;  %s1504_s15 = int_to_ptr.vmem [resolvable:$false] %s1503_s15 }
  0x85   : > { %s1505_s17 = scalar_lea.vmem %s1504_s15, 512  ;;  %p1506_p1 = scmp.lt.s32.totalorder %s375_s12, %s1504_s15 }
  0x86   : > { %p1501_p9 = pnand %p1499_p8, %p1800_p11  ;;  %p1507_p5 = scmp.lt.s32.totalorder %s1505_s17, %s1498_s28 }
  0x88   : > { %p1502_p10 = pneg %p1501_p9  ;;  %p1508_p12 = por %p1507_p5, %p1506_p1 }
  0x8a   : > { %p1509_p0 = pnand %p1508_p12, %p1502_p10 }
  0x8c   : > { %1512 = shalt.err (!%p1509_p0)
}
  0x8d   : > { %1298 = dma.hbm_to_vmem [thread:$0]  (!%p1780_p4), %s1875_s22, 256, %s375_s12, %s1794_s19, %s2098_s18, %s2098_s18, %s2097_s30  }
  0x8e   : > { %p2099_p11 = scmp.ne.s32.totalorder %s2085_s23, 0 }
  0x8f   : > { %s1901_s0 = sand.u32 (!%p2099_p11), 1, %s1607_s10   ;;  %p2100_p6 = scmp.ne.s32.totalorder (!%p2099_p11), %s2081_s20, 0 }
  0x90   : > { %386 = sbr.rel (%p2099_p11) target bundleno = 796 (0x31c), region = 52  ;;  %s1904_s14 = sshll.u32 (!%p2099_p11), %s1901_s0, 4 }
  0x91   : > { %s389_s16 = scalar_lea.sflag (!%p2099_p11), [#allocation3], %s1901_s0  ;;  %s392_s27 = scalar_lea.vmem (!%p2099_p11), [#allocation2], %s1904_s14 }
  0x95   : > { %1582 = dma.done.wait (%p2100_p6), %s389_s16, 256  }
  0x96   : > { %1584 = vsyncadd (%p2100_p6), %s389_s16, 4294967040  ;;  %s397_s23 = sand.u32 1, %s1702_s13   ;;  %s401_s30 = scalar_lea.vmem [#allocation5], %s1904_s14 }
  0x97   : > { %s398_s19 = scalar_lea.sflag [#allocation6], %s397_s23 }
  0x98   : > { %1586 = dma.done.wait (%p2100_p6), %s398_s19, 512  }
  0x99   : > { %1588 = vsyncadd (%p2100_p6), %s398_s19, 4294966784  ;;  %s410_s18 = scalar_lea.vmem [#allocation7], %s1904_s14  ;;  %p2101_p4 = scmp.eq.s32.totalorder %s1702_s13, 0 }
  0x9b   : > { %1590 = dma.done.wait (%p2101_p4), [#allocation9], 16384   ;;  %p2102_p13 = pmov %p2101_p4 }
  0x9c   : > { %v1626_v0 = vmov 0.0   ;;  %v602_v1 = vld [vmem:[#allocation10 + $0x1e8] sm:$0xff]  ;;  %v604_v2 = vld [vmem:[#allocation10 + $0x1f8] sm:$0xff]  ;;  %v601_v3 = vld [vmem:[#allocation10 + $0x1e0] sm:$0xff]  ;;  %s1262_s3 = sshll.u32 %s1702_s13, 8  ;;  %s467_s25 = scalar_lea.vmem [#allocation12], %s1904_s14 }
  0x9d   : > { %1592 = vsyncadd (%p2102_p13), [#allocation9], 4294950912  ;;  %669 = vmatprep.mubr.f32.mxu0 %v1626_v0  ;;  %746 = vmatprep.mubr.f32.mxu1 %v1626_v0  ;;  %v603_v4 = vld [vmem:[#allocation10 + $0x1f0] sm:$0xff]  ;;  %v598_v5 = vld [vmem:[#allocation10 + $0x1c8] sm:$0xff]  ;;  %s1060_s28 = sshll.u32 %s467_s25, 4  ;;  %s1962_s17 = scalar_lea.hbm %s2053_s9, %s1262_s3  ;;  %s1964_s28 = int_to_ptr.vmem [resolvable:$true] %s1060_s28 }
  0x9e   : > { %605 = vmatprep.subr.mxu0 %v602_v1  ;;  %682 = vmatprep.subr.mxu1 %v604_v2  ;;  %v600_v6 = vld [vmem:[#allocation10 + $0x1d8] sm:$0xff]  ;;  %v597_v7 = vld [vmem:[#allocation10 + $0x1c0] sm:$0xff]  ;;  %v599_v8 = vld [vmem:[#allocation10 + $0x1d0] sm:$0xff]  ;;  %s1031_s16 = scalar_lea.sflag [#allocation13], %s1901_s0  ;;  %p2103_p7 = scmp.ne.s32.totalorder %s2082_s21, 0 }
  0x9f   : > { %606 = vmatpush1.msra.mxu0 %v601_v3  ;;  %683 = vmatpush1.msra.mxu1 %v603_v4  ;;  %v594_v9 = vld [vmem:[#allocation10 + $0x1a8] sm:$0xff]  ;;  %v596_v10 = vld [vmem:[#allocation10 + $0x1b8] sm:$0xff]  ;;  %v593_v11 = vld [vmem:[#allocation10 + $0x1a0] sm:$0xff]  ;;  %s1627_s23 = smov [#allocation12]  }
  0xa0   : > { %607 = vmatprep.subr.mxu0 %v598_v5  ;;  %684 = vmatprep.subr.mxu1 %v600_v6  ;;  %v595_v12 = vld [vmem:[#allocation10 + $0x1b0] sm:$0xff]  ;;  %v590_v13 = vld [vmem:[#allocation10 + $0x188] sm:$0xff]  ;;  %v592_v14 = vld [vmem:[#allocation10 + $0x198] sm:$0xff]  ;;  %s1517_s19 = sshll.u32 %s1627_s23, 4  ;;  %s1518_s19 = int_to_ptr.vmem [resolvable:$false] %s1517_s19 }
  0xa1   : > { %608 = vmatpush1.msra.mxu0 %v597_v7  ;;  %685 = vmatpush1.msra.mxu1 %v599_v8  ;;  %v589_v15 = vld [vmem:[#allocation10 + $0x180] sm:$0xff]  ;;  %v591_v16 = vld [vmem:[#allocation10 + $0x190] sm:$0xff]  ;;  %v586_v17 = vld [vmem:[#allocation10 + $0x168] sm:$0xff]  ;;  %p1520_p9 = scmp.lt.s32.totalorder %s1964_s28, %s1518_s19 }
  0xa2   : > { %609 = vmatprep.subr.mxu0 %v594_v9  ;;  %686 = vmatprep.subr.mxu1 %v596_v10  ;;  %v588_v18 = vld [vmem:[#allocation10 + $0x178] sm:$0xff]  ;;  %v585_v19 = vld [vmem:[#allocation10 + $0x160] sm:$0xff]  ;;  %v587_v20 = vld [vmem:[#allocation10 + $0x170] sm:$0xff] }
  0xa3   : > { %610 = vmatpush1.msra.mxu0 %v593_v11  ;;  %687 = vmatpush1.msra.mxu1 %v595_v12  ;;  %v582_v21 = vld [vmem:[#allocation10 + $0x148] sm:$0xff]  ;;  %v584_v22 = vld [vmem:[#allocation10 + $0x158] sm:$0xff]  ;;  %v581_v23 = vld [vmem:[#allocation10 + $0x140] sm:$0xff] }
  0xa4   : > { %611 = vmatprep.subr.mxu0 %v590_v13  ;;  %688 = vmatprep.subr.mxu1 %v592_v14  ;;  %v583_v24 = vld [vmem:[#allocation10 + $0x150] sm:$0xff]  ;;  %v578_v25 = vld [vmem:[#allocation10 + $0x128] sm:$0xff]  ;;  %v580_v26 = vld [vmem:[#allocation10 + $0x138] sm:$0xff] }
  0xa5   : > { %612 = vmatpush1.msra.mxu0 %v589_v15  ;;  %689 = vmatpush1.msra.mxu1 %v591_v16  ;;  %v577_v27 = vld [vmem:[#allocation10 + $0x120] sm:$0xff]  ;;  %v579_v28 = vld [vmem:[#allocation10 + $0x130] sm:$0xff]  ;;  %v574_v29 = vld [vmem:[#allocation10 + $0x108] sm:$0xff] }
  0xa6   : > { %613 = vmatprep.subr.mxu0 %v586_v17  ;;  %690 = vmatprep.subr.mxu1 %v588_v18  ;;  %v576_v30 = vld [vmem:[#allocation10 + $0x118] sm:$0xff]  ;;  %v573_v31 = vld [vmem:[#allocation10 + $0x100] sm:$0xff]  ;;  %v575_v32 = vld [vmem:[#allocation10 + $0x110] sm:$0xff] }
  0xa7   : > { %614 = vmatpush1.msra.mxu0 %v585_v19  ;;  %691 = vmatpush1.msra.mxu1 %v587_v20  ;;  %v570_v33 = vld [vmem:[#allocation10 + $0xe8] sm:$0xff]  ;;  %v572_v34 = vld [vmem:[#allocation10 + $0xf8] sm:$0xff]  ;;  %v569_v35 = vld [vmem:[#allocation10 + $0xe0] sm:$0xff] }
  0xa8   : > { %615 = vmatprep.subr.mxu0 %v582_v21  ;;  %692 = vmatprep.subr.mxu1 %v584_v22  ;;  %v571_v36 = vld [vmem:[#allocation10 + $0xf0] sm:$0xff]  ;;  %v566_v37 = vld [vmem:[#allocation10 + $0xc8] sm:$0xff]  ;;  %v568_v38 = vld [vmem:[#allocation10 + $0xd8] sm:$0xff] }
  0xa9   : > { %616 = vmatpush1.msra.mxu0 %v581_v23  ;;  %693 = vmatpush1.msra.mxu1 %v583_v24  ;;  %v565_v39 = vld [vmem:[#allocation10 + $0xc0] sm:$0xff]  ;;  %v567_v40 = vld [vmem:[#allocation10 + $0xd0] sm:$0xff]  ;;  %v562_v41 = vld [vmem:[#allocation10 + $0xa8] sm:$0xff] }
  0xaa   : > { %617 = vmatprep.subr.mxu0 %v578_v25  ;;  %694 = vmatprep.subr.mxu1 %v580_v26  ;;  %v564_v42 = vld [vmem:[#allocation10 + $0xb8] sm:$0xff]  ;;  %v561_v43 = vld [vmem:[#allocation10 + $0xa0] sm:$0xff]  ;;  %v563_v44 = vld [vmem:[#allocation10 + $0xb0] sm:$0xff] }
  0xab   : > { %618 = vmatpush1.msra.mxu0 %v577_v27  ;;  %695 = vmatpush1.msra.mxu1 %v579_v28  ;;  %v558_v45 = vld [vmem:[#allocation10 + $0x88] sm:$0xff]  ;;  %v560_v46 = vld [vmem:[#allocation10 + $0x98] sm:$0xff]  ;;  %v557_v47 = vld [vmem:[#allocation10 + $0x80] sm:$0xff] }
  0xac   : > { %619 = vmatprep.subr.mxu0 %v574_v29  ;;  %696 = vmatprep.subr.mxu1 %v576_v30  ;;  %v559_v48 = vld [vmem:[#allocation10 + $0x90] sm:$0xff]  ;;  %v554_v49 = vld [vmem:[#allocation10 + $0x68] sm:$0xff]  ;;  %v556_v50 = vld [vmem:[#allocation10 + $0x78] sm:$0xff] }
  0xad   : > { %620 = vmatpush1.msra.mxu0 %v573_v31  ;;  %697 = vmatpush1.msra.mxu1 %v575_v32  ;;  %v553_v51 = vld [vmem:[#allocation10 + $0x60] sm:$0xff]  ;;  %v555_v52 = vld [vmem:[#allocation10 + $0x70] sm:$0xff]  ;;  %v550_v53 = vld [vmem:[#allocation10 + $0x48] sm:$0xff] }
  0xae   : > { %621 = vmatprep.subr.mxu0 %v570_v33  ;;  %698 = vmatprep.subr.mxu1 %v572_v34  ;;  %v552_v54 = vld [vmem:[#allocation10 + $0x58] sm:$0xff]  ;;  %v549_v55 = vld [vmem:[#allocation10 + $0x40] sm:$0xff]  ;;  %v551_v56 = vld [vmem:[#allocation10 + $0x50] sm:$0xff] }
  0xaf   : > { %622 = vmatpush1.msra.mxu0 %v569_v35  ;;  %699 = vmatpush1.msra.mxu1 %v571_v36  ;;  %v546_v57 = vld [vmem:[#allocation10 + $0x28] sm:$0xff]  ;;  %v548_v58 = vld [vmem:[#allocation10 + $0x38] sm:$0xff]  ;;  %v545_v59 = vld [vmem:[#allocation10 + $0x20] sm:$0xff] }
  0xb0   : > { %623 = vmatprep.subr.mxu0 %v566_v37  ;;  %700 = vmatprep.subr.mxu1 %v568_v38  ;;  %v547_v60 = vld [vmem:[#allocation10 + $0x30] sm:$0xff]  ;;  %v542_v61 = vld [vmem:[#allocation10 + $0x8] sm:$0xff]  ;;  %v544_v62 = vld [vmem:[#allocation10 + $0x18] sm:$0xff] }
  0xb1   : > { %624 = vmatpush1.msra.mxu0 %v565_v39  ;;  %701 = vmatpush1.msra.mxu1 %v567_v40  ;;  %v541_v63 = vld [vmem:[#allocation10] sm:$0xff]  ;;  %v543_v1 = vld [vmem:[#allocation10 + $0x10] sm:$0xff]  ;;  %v536_v3 = vld [vmem:[#allocation8 + $0x1e8] sm:$0xff] }
  0xb2   : > { %625 = vmatprep.subr.mxu0 %v562_v41  ;;  %702 = vmatprep.subr.mxu1 %v564_v42  ;;  %v539_v2 = vld [vmem:[%s401_s30] sm:$0xff]  ;;  %v538_v4 = vld [vmem:[#allocation8 + $0x1f8] sm:$0xff]  ;;  %v532_v7 = vld [vmem:[#allocation8 + $0x1c8] sm:$0xff] }
  0xb3   : > { %626 = vmatpush1.msra.mxu0 %v561_v43  ;;  %703 = vmatpush1.msra.mxu1 %v563_v44  ;;  %v535_v5 = vld [vmem:[#allocation8 + $0x1e0] sm:$0xff]  ;;  %v537_v6 = vld [vmem:[#allocation8 + $0x1f0] sm:$0xff]  ;;  %v534_v8 = vld [vmem:[#allocation8 + $0x1d8] sm:$0xff] }
  0xb4   : > { %627 = vmatprep.subr.mxu0 %v558_v45  ;;  %704 = vmatprep.subr.mxu1 %v560_v46  ;;  %v531_v9 = vld [vmem:[#allocation8 + $0x1c0] sm:$0xff]  ;;  %v533_v10 = vld [vmem:[#allocation8 + $0x1d0] sm:$0xff]  ;;  %v528_v11 = vld [vmem:[#allocation8 + $0x1a8] sm:$0xff] }
  0xb5   : > { %628 = vmatpush1.msra.mxu0 %v557_v47  ;;  %705 = vmatpush1.msra.mxu1 %v559_v48  ;;  %v530_v12 = vld [vmem:[#allocation8 + $0x1b8] sm:$0xff]  ;;  %v527_v13 = vld [vmem:[#allocation8 + $0x1a0] sm:$0xff]  ;;  %v529_v14 = vld [vmem:[#allocation8 + $0x1b0] sm:$0xff] }
  0xb6   : > { %629 = vmatprep.subr.mxu0 %v554_v49  ;;  %706 = vmatprep.subr.mxu1 %v556_v50  ;;  %v524_v15 = vld [vmem:[#allocation8 + $0x188] sm:$0xff]  ;;  %v526_v16 = vld [vmem:[#allocation8 + $0x198] sm:$0xff]  ;;  %v523_v17 = vld [vmem:[#allocation8 + $0x180] sm:$0xff] }
  0xb7   : > { %630 = vmatpush1.msra.mxu0 %v553_v51  ;;  %707 = vmatpush1.msra.mxu1 %v555_v52  ;;  %v525_v18 = vld [vmem:[#allocation8 + $0x190] sm:$0xff]  ;;  %v520_v19 = vld [vmem:[#allocation8 + $0x168] sm:$0xff]  ;;  %v522_v20 = vld [vmem:[#allocation8 + $0x178] sm:$0xff] }
  0xb8   : > { %631 = vmatprep.subr.mxu0 %v550_v53  ;;  %708 = vmatprep.subr.mxu1 %v552_v54  ;;  %v519_v21 = vld [vmem:[#allocation8 + $0x160] sm:$0xff]  ;;  %v521_v22 = vld [vmem:[#allocation8 + $0x170] sm:$0xff]  ;;  %v516_v23 = vld [vmem:[#allocation8 + $0x148] sm:$0xff] }
  0xb9   : > { %632 = vmatpush1.msra.mxu0 %v549_v55  ;;  %709 = vmatpush1.msra.mxu1 %v551_v56  ;;  %v518_v24 = vld [vmem:[#allocation8 + $0x158] sm:$0xff]  ;;  %v515_v25 = vld [vmem:[#allocation8 + $0x140] sm:$0xff]  ;;  %v517_v26 = vld [vmem:[#allocation8 + $0x150] sm:$0xff] }
  0xba   : > { %633 = vmatprep.subr.mxu0 %v546_v57  ;;  %710 = vmatprep.subr.mxu1 %v548_v58  ;;  %v512_v27 = vld [vmem:[#allocation8 + $0x128] sm:$0xff]  ;;  %v514_v28 = vld [vmem:[#allocation8 + $0x138] sm:$0xff]  ;;  %v511_v29 = vld [vmem:[#allocation8 + $0x120] sm:$0xff] }
  0xbb   : > { %634 = vmatpush1.msra.mxu0 %v545_v59  ;;  %711 = vmatpush1.msra.mxu1 %v547_v60  ;;  %v513_v30 = vld [vmem:[#allocation8 + $0x130] sm:$0xff]  ;;  %v508_v31 = vld [vmem:[#allocation8 + $0x108] sm:$0xff]  ;;  %v510_v32 = vld [vmem:[#allocation8 + $0x118] sm:$0xff] }
  0xbc   : > { %635 = vmatprep.subr.mxu0 %v542_v61  ;;  %712 = vmatprep.subr.mxu1 %v544_v62  ;;  %v507_v33 = vld [vmem:[#allocation8 + $0x100] sm:$0xff]  ;;  %v509_v34 = vld [vmem:[#allocation8 + $0x110] sm:$0xff]  ;;  %v504_v35 = vld [vmem:[#allocation8 + $0xe8] sm:$0xff] }
  0xbd   : > { %636 = vmatpush1.msra.mxu0 %v541_v63  ;;  %713 = vmatpush1.msra.mxu1 %v543_v1  ;;  %v506_v36 = vld [vmem:[#allocation8 + $0xf8] sm:$0xff]  ;;  %v503_v37 = vld [vmem:[#allocation8 + $0xe0] sm:$0xff]  ;;  %v505_v38 = vld [vmem:[#allocation8 + $0xf0] sm:$0xff] }
  0xbe   : > { %670 = vmatmul.mubr.f32.vlgmr.msra.gmra.mxu0 %v539_v2  ;;  %759 = vmatprep.subr.mxu0 %v536_v3  ;;  %v500_v39 = vld [vmem:[#allocation8 + $0xc8] sm:$0xff]  ;;  %v502_v40 = vld [vmem:[#allocation8 + $0xd8] sm:$0xff]  ;;  %v499_v41 = vld [vmem:[#allocation8 + $0xc0] sm:$0xff] }
  0xbf   : > { %836 = vmatprep.subr.mxu1 %v538_v4  ;;  %747 = vmatmul.mubr.f32.vlgmr.msra.gmra.mxu1 %v539_v2  ;;  %v501_v42 = vld [vmem:[#allocation8 + $0xd0] sm:$0xff]  ;;  %v496_v43 = vld [vmem:[#allocation8 + $0xa8] sm:$0xff]  ;;  %v498_v44 = vld [vmem:[#allocation8 + $0xb8] sm:$0xff] }
  0xc0   : > { %760 = vmatpush1.msra.mxu0 %v535_v5  ;;  %837 = vmatpush1.msra.mxu1 %v537_v6  ;;  %v495_v45 = vld [vmem:[#allocation8 + $0xa0] sm:$0xff]  ;;  %v497_v46 = vld [vmem:[#allocation8 + $0xb0] sm:$0xff]  ;;  %v492_v47 = vld [vmem:[#allocation8 + $0x88] sm:$0xff] }
  0xc1   : > { %761 = vmatprep.subr.mxu0 %v532_v7  ;;  %838 = vmatprep.subr.mxu1 %v534_v8  ;;  %v494_v48 = vld [vmem:[#allocation8 + $0x98] sm:$0xff]  ;;  %v491_v49 = vld [vmem:[#allocation8 + $0x80] sm:$0xff]  ;;  %v493_v50 = vld [vmem:[#allocation8 + $0x90] sm:$0xff]  ;;  %v915_v7 = vlaneseq }
  0xc2   : > { %762 = vmatpush1.msra.mxu0 %v531_v9  ;;  %839 = vmatpush1.msra.mxu1 %v533_v10  ;;  %v488_v51 = vld [vmem:[#allocation8 + $0x68] sm:$0xff]  ;;  %v490_v52 = vld [vmem:[#allocation8 + $0x78] sm:$0xff]  ;;  %v487_v53 = vld [vmem:[#allocation8 + $0x60] sm:$0xff] }
  0xc3   : > { %763 = vmatprep.subr.mxu0 %v528_v11  ;;  %840 = vmatprep.subr.mxu1 %v530_v12  ;;  %v489_v54 = vld [vmem:[#allocation8 + $0x70] sm:$0xff]  ;;  %v540_v55 = vld [vmem:[%s401_s30 + $0x8] sm:$0xff]  ;;  %v483_v58 = vld [vmem:[#allocation8 + $0x40] sm:$0xff]  ;;  %v916_v8 = vshrl.u32 %v915_v7, 7  ;;  %s1519_s30 = scalar_lea.vmem %s1518_s19, 512 }
  0xc4   : > { %764 = vmatpush1.msra.mxu0 %v527_v13  ;;  %841 = vmatpush1.msra.mxu1 %v529_v14  ;;  %v484_v56 = vld [vmem:[#allocation8 + $0x48] sm:$0xff]  ;;  %v486_v57 = vld [vmem:[#allocation8 + $0x58] sm:$0xff]  ;;  %v485_v59 = vld [vmem:[#allocation8 + $0x50] sm:$0xff] }
  0xc5   : > { %765 = vmatprep.subr.mxu0 %v524_v15  ;;  %842 = vmatprep.subr.mxu1 %v526_v16  ;;  %v480_v60 = vld [vmem:[#allocation8 + $0x28] sm:$0xff]  ;;  %v482_v61 = vld [vmem:[#allocation8 + $0x38] sm:$0xff]  ;;  %v479_v62 = vld [vmem:[#allocation8 + $0x20] sm:$0xff]  ;;  %v925_v9 = vsub.s32 2, %v916_v8 }
  0xc6   : > { %766 = vmatpush1.msra.mxu0 %v523_v17  ;;  %843 = vmatpush1.msra.mxu1 %v525_v18  ;;  %v481_v63 = vld [vmem:[#allocation8 + $0x30] sm:$0xff]  ;;  %v476_v1 = vld [vmem:[#allocation8 + $0x8] sm:$0xff]  ;;  %v478_v2 = vld [vmem:[#allocation8 + $0x18] sm:$0xff]  ;;  %v917_v18 = vsub.s32 0, %v916_v8 }
  0xc7   : > { %767 = vmatprep.subr.mxu0 %v520_v19  ;;  %844 = vmatprep.subr.mxu1 %v522_v20  ;;  %v475_v3 = vld [vmem:[#allocation8] sm:$0xff]  ;;  %v477_v4 = vld [vmem:[#allocation8 + $0x10] sm:$0xff]  ;;  %v474_v6 = vld [vmem:[%s392_s27 + $0x8] sm:$0xff]  ;;  %v921_v19 = vsub.s32 1, %v916_v8 }
  0xc8   : > { %768 = vmatpush1.msra.mxu0 %v519_v21  ;;  %845 = vmatpush1.msra.mxu1 %v521_v22  ;;  %v473_v5 = vld [vmem:[%s392_s27] sm:$0xff]  ;;  %s1513_s27 = scalar_lea.vmem %s1964_s28, 256 }
  0xc9   : > { %769 = vmatprep.subr.mxu0 %v516_v23  ;;  %846 = vmatprep.subr.mxu1 %v518_v24  ;;  %v913_v10 = vld [vmem:[%s2049_s5] sm:$0xf]  ;;  %p1514_p2 = scmp.ne.s32.totalorder %s1964_s28, %s1513_s27  ;;  %p1521_p10 = scmp.lt.s32.totalorder %s1519_s30, %s1513_s27 }
  0xca   : > { %770 = vmatpush1.msra.mxu0 %v515_v25  ;;  %847 = vmatpush1.msra.mxu1 %v517_v26  ;;  %v926_v11 = vrot.slane %v913_v10, %v925_v9  ;;  %v918_v21 = vrot.slane %v913_v10, %v917_v18  ;;  %v922_v26 = vrot.slane %v913_v10, %v921_v19 }
  0xcb   : > { %771 = vmatprep.subr.mxu0 %v512_v27  ;;  %848 = vmatprep.subr.mxu1 %v514_v28  ;;  %v929_v27 = vsub.s32 3, %v916_v8  ;;  %p1515_p3 = pnand %p1514_p2, %p2103_p7  ;;  %p1522_p1 = por %p1521_p10, %p1520_p9 }
  0xcc   : > { %772 = vmatpush1.msra.mxu0 %v511_v29  ;;  %849 = vmatpush1.msra.mxu1 %v513_v30 }
  0xcd   : > { %773 = vmatprep.subr.mxu0 %v508_v31  ;;  %850 = vmatprep.subr.mxu1 %v510_v32  ;;  %p1516_p8 = pneg %p1515_p3 }
  0xce   : > { %774 = vmatpush1.msra.mxu0 %v507_v33  ;;  %851 = vmatpush1.msra.mxu1 %v509_v34 }
  0xcf   : > { %775 = vmatprep.subr.mxu0 %v504_v35  ;;  %852 = vmatprep.subr.mxu1 %v506_v36  ;;  %p1523_p5 = pnand %p1522_p1, %p1516_p8 }
  0xd0   : > { %776 = vmatpush1.msra.mxu0 %v503_v37  ;;  %853 = vmatpush1.msra.mxu1 %v505_v38  ;;  %v930_v38 = vrot.slane %v913_v10, %v929_v27 }
  0xd1   : > { %777 = vmatprep.subr.mxu0 %v500_v39  ;;  %854 = vmatprep.subr.mxu1 %v502_v40 }
  0xd2   : > { %778 = vmatpush1.msra.mxu0 %v499_v41  ;;  %855 = vmatpush1.msra.mxu1 %v501_v42 }
  0xd3   : > { %779 = vmatprep.subr.mxu0 %v496_v43  ;;  %856 = vmatprep.subr.mxu1 %v498_v44 }
  0xd4   : > { %780 = vmatpush1.msra.mxu0 %v495_v45  ;;  %857 = vmatpush1.msra.mxu1 %v497_v46 }
  0xd5   : > { %781 = vmatprep.subr.mxu0 %v492_v47  ;;  %858 = vmatprep.subr.mxu1 %v494_v48 }
  0xd6   : > { %782 = vmatpush1.msra.mxu0 %v491_v49  ;;  %859 = vmatpush1.msra.mxu1 %v493_v50 }
  0xd7   : > { %783 = vmatprep.subr.mxu0 %v488_v51  ;;  %860 = vmatprep.subr.mxu1 %v490_v52 }
  0xd8   : > { %675 = vmatprep.mubr.f32.mxu0 %v1626_v0  ;;  %784 = vmatpush1.msra.mxu0 %v487_v53 }
  0xd9   : > { %861 = vmatpush1.msra.mxu1 %v489_v54  ;;  %676 = vmatmul.mubr.f32.gmra.mxu0 %v540_v55 }
  0xda   : > { %785 = vmatprep.subr.mxu0 %v484_v56  ;;  %862 = vmatprep.subr.mxu1 %v486_v57 }
  0xdb   : > { %752 = vmatprep.mubr.f32.mxu1 %v1626_v0  ;;  %786 = vmatpush1.msra.mxu0 %v483_v58  ;;  %v969_v58 = vld [vmem:[%s410_s18] sm:$0xff] }
  0xdc   : > { %863 = vmatpush1.msra.mxu1 %v485_v59  ;;  %787 = vmatprep.subr.mxu0 %v480_v60 }
  0xdd   : > { %753 = vmatmul.mubr.f32.gmra.mxu1 %v540_v55  ;;  %864 = vmatprep.subr.mxu1 %v482_v61 }
  0xde   : > { %788 = vmatpush1.msra.mxu0 %v479_v62  ;;  %865 = vmatpush1.msra.mxu1 %v481_v63 }
  0xdf   : > { %789 = vmatprep.subr.mxu0 %v476_v1  ;;  %866 = vmatprep.subr.mxu1 %v478_v2 }
  0xe0   : > { %790 = vmatpush1.msra.mxu0 %v475_v3  ;;  %823 = vmatprep.mubr.f32.mxu0 %v1626_v0 }
  0xe1   : > { %867 = vmatpush1.msra.mxu1 %v477_v4  ;;  %900 = vmatprep.mubr.f32.mxu1 %v1626_v0 }
  0xe2   : > { %824 = vmatmul.mubr.f32.vlgmr.msra.gmra.mxu0 %v473_v5  ;;  %901 = vmatmul.mubr.f32.vlgmr.msra.gmra.mxu1 %v473_v5 }
  0xe3   : > { %829 = vmatprep.mubr.f32.mxu0 %v1626_v0  ;;  %906 = vmatprep.mubr.f32.mxu1 %v1626_v0 }
  0xe6   : > { %830 = vmatmul.mubr.f32.gmra.mxu0 %v474_v6  ;;  %907 = vmatmul.mubr.f32.gmra.mxu1 %v474_v6  ;;  %v970_v6 = vld [vmem:[%s410_s18 + $0x8] sm:$0xff] }
 0x17e   : > { %v671_v12 = vpop.f32.mrf.mxu0 }
 0x17f   : > { %v748_v13 = vpop.f32.mrf.mxu1 }
 0x180   : > { %v673_v14 = vpop.f32.mrf.mxu0 }
 0x181   : > { %v750_v15 = vpop.f32.mrf.mxu1 }
 0x199   : > { %v677_v16 = vpop.f32.mrf.mxu0 }
 0x19b   : > { %v679_v20 = vpop.f32.mrf.mxu0 }
 0x19d   : > { %v754_v17 = vpop.f32.mrf.mxu1 }
 0x19f   : > { %v756_v0 = vpop.f32.mrf.mxu1 }
 0x1a2   : > { %v825_v22 = vpop.f32.mrf.mxu0  ;;  %v902_v23 = vpop.f32.mrf.mxu1 }
 0x1a3   : > { %v826_v24 = vadd.f32 %v825_v22, %v671_v12  ;;  %v903_v25 = vadd.f32 %v902_v23, %v748_v13 }
 0x1a4   : > { %v827_v28 = vpop.f32.mrf.mxu0  ;;  %v904_v29 = vpop.f32.mrf.mxu1 }
 0x1a5   : > { %v935_v30 = vadd.f32 %v918_v21, %v826_v24  ;;  %v1942_v31 = vadd.f32 %v926_v11, %v903_v25  ;;  %v828_v32 = vadd.f32 %v827_v28, %v673_v14  ;;  %v905_v37 = vadd.f32 %v904_v29, %v750_v15  ;;  %v1249_v28 = vld [vmem:[%s2050_s6] ss:$0 sm:$0xff] }
 0x1a6   : > { %v831_v33 = vpop.f32.mrf.mxu0  ;;  %v908_v34 = vpop.f32.mrf.mxu1 }
 0x1a7   : > { %v943_v35 = vmul.f32 0.5, %v935_v30  ;;  %v936_v36 = vadd.f32 %v922_v26, %v828_v32  ;;  %v832_v39 = vadd.f32 %v831_v33, %v677_v16  ;;  %v909_v40 = vadd.f32 %v908_v34, %v754_v17  ;;  %v1250_v30 = vld [vmem:[%s2051_s7] ss:$0 sm:$0xff] }
 0x1a8   : > { %v833_v41 = vpop.f32.mrf.mxu0  ;;  %v910_v44 = vpop.f32.mrf.mxu1  ;;  %v938_v47 = vadd.f32 %v930_v38, %v905_v37  ;;  %v945_v25 = vmul.f32 0.5, %v1942_v31 }
 0x1a9   : > { %1353 = vtanh.f32 %v943_v35  ;;  %v944_v42 = vmul.f32 0.5, %v936_v36  ;;  %v834_v43 = vadd.f32 %v833_v41, %v679_v20  ;;  %v939_v45 = vadd.f32 %v918_v21, %v832_v39 }
 0x1aa   : > { %v941_v46 = vadd.f32 %v926_v11, %v909_v40  ;;  %v911_v50 = vadd.f32 %v910_v44, %v756_v0 }
 0x1ab   : > { %1355 = vtanh.f32 %v944_v42  ;;  %v940_v48 = vadd.f32 %v922_v26, %v834_v43  ;;  %v946_v49 = vmul.f32 0.5, %v939_v45 }
 0x1ac   : > { %v942_v52 = vadd.f32 %v930_v38, %v911_v50  ;;  %v948_v27 = vmul.f32 0.5, %v941_v46 }
 0x1ad   : > { %v947_v51 = vmul.f32 0.5, %v940_v48  ;;  %1357 = vtanh.f32 %v946_v49 }
 0x1ae   : > { %1359 = vtanh.f32 %v938_v47 }
 0x1af   : > { %1361 = vtanh.f32 %v947_v51 }
 0x1b0   : > { %1363 = vtanh.f32 %v942_v52 }
 0x1b6   : > { %v1354_v53 = vpop.eup %1353 }
 0x1b7   : > { %v955_v54 = vmul.f32 0.5, %v1354_v53 }
 0x1b8   : > { %v1356_v55 = vpop.eup %1355 }
 0x1b9   : > { %v956_v56 = vmul.f32 0.5, %v1356_v55  ;;  %v961_v57 = vadd.f32 0.5, %v955_v54 }
 0x1ba   : > { %v1358_v59 = vpop.eup %1357 }
 0x1bb   : > { %v962_v60 = vadd.f32 0.5, %v956_v56  ;;  %v1360_v61 = vpop.eup %1359  ;;  %v958_v62 = vmul.f32 0.5, %v1358_v59 }
 0x1bc   : > { %v1362_v63 = vpop.eup %1361  ;;  %v973_v2 = vmul.f32 %v1360_v61, %v961_v57 }
 0x1bd   : > { %v971_v1 = vmul.f32 %v969_v58, %v962_v60  ;;  %v959_v3 = vmul.f32 0.5, %v1362_v63  ;;  %v964_v4 = vadd.f32 0.5, %v958_v62  ;;  %v1364_v8 = vpop.eup %1363 }
 0x1bf   : > { %v975_v5 = vadd.f32 %v973_v2, %v971_v1  ;;  %v965_v7 = vadd.f32 0.5, %v959_v3  ;;  %v974_v10 = vmul.f32 %v1364_v8, %v964_v4 }
 0x1c1   : > { %977 = vadd.xlane.f32.xlu0 %v975_v5  ;;  %v972_v9 = vmul.f32 %v970_v6, %v965_v7 }
 0x1c3   : > { %v976_v11 = vadd.f32 %v974_v10, %v972_v9 }
 0x1c5   : > { %979 = vadd.xlane.f32.xlu0 %v976_v11 }
 0x24a   : > { %v978_v12 = vpop.xlane.xlu0 %977 }
 0x24b   : > { %v981_v13 = vmul.f32 0.0078125, %v978_v12 }
 0x24d   : > { %v983_v14 = vsub.f32 %v975_v5, %v981_v13 }
 0x24e   : > { %v980_v15 = vpop.xlane.xlu0 %979 }
 0x24f   : > { %v985_v16 = vmul.f32 %v983_v14, %v983_v14  ;;  %v982_v17 = vmul.f32 0.0078125, %v980_v15 }
 0x251   : > { %987 = vadd.xlane.f32.xlu1 %v985_v16  ;;  %v984_v18 = vsub.f32 %v976_v11, %v982_v17 }
 0x253   : > { %v986_v0 = vmul.f32 %v984_v18, %v984_v18 }
 0x255   : > { %989 = vadd.xlane.f32.xlu1 %v986_v0 }
 0x2da   : > { %v988_v19 = vpop.xlane.xlu1 %987 }
 0x2db   : > { %v991_v20 = vmul.f32 0.0078125, %v988_v19 }
 0x2dd   : > { %v993_v21 = vadd.f32 1e-05, %v991_v20 }
 0x2de   : > { %v990_v22 = vpop.xlane.xlu1 %989 }
 0x2df   : > { %1365 = vrsqrt.f32 %v993_v21  ;;  %v992_v23 = vmul.f32 0.0078125, %v990_v22 }
 0x2e1   : > { %v994_v24 = vadd.f32 1e-05, %v992_v23 }
 0x2e3   : > { %1367 = vrsqrt.f32 %v994_v24 }
 0x2e4   : > { %1369 = vtanh.f32 %v945_v25 }
 0x2e5   : > { %1371 = vtanh.f32 %v948_v27 }
 0x2ec   : > { %v1366_v26 = vpop.eup %1365 }
 0x2ed   : > { %v997_v29 = vmul.f32 %v1366_v26, %v983_v14 }
 0x2ef   : > { %v1006_v32 = vmul.f32 %v1249_v28, %v997_v29 }
 0x2f0   : > { %v1368_v33 = vpop.eup %1367 }
 0x2f1   : > { %v1015_v34 = vadd.f32 %v1250_v30, %v1006_v32  ;;  %v998_v35 = vmul.f32 %v1368_v33, %v984_v18  ;;  %v1370_v37 = vpop.eup %1369 }
 0x2f3   : > { %1373 = vtanh.f32 %v1015_v34  ;;  %1023 = vst [vmem:[%s467_s25] sm:$0xff] %v1015_v34  ;;  %v1007_v31 = vmul.f32 %v1249_v28, %v998_v35 }
 0x2f5   : > { %v1016_v36 = vadd.f32 %v1250_v30, %v1007_v31 }
 0x2f7   : > { %1375 = vtanh.f32 %v1016_v36  ;;  %1024 = vst [vmem:[%s467_s25 + $0x8] sm:$0xff] %v1016_v36 }
 0x2f8   : > { %1526 = shalt.err (!%p1523_p5)
}
 0x2f9   : > { %s1527_s18 = scalar_lea.hbm %s1962_s17, 256  ;;  %s1531_s12 = scalar_lea.hbm %s2053_s9, 512 }
 0x2fa   : > { %p1528_p12 = scmp.ne.s32.totalorder %s1962_s17, %s1527_s18  ;;  %p1532_p6 = scmp.lt.s32.totalorder %s1962_s17, %s2053_s9 }
 0x2fb   : > { %p1533_p4 = scmp.lt.s32.totalorder %s1531_s12, %s1527_s18 }
 0x2fc   : > { %p1529_p0 = pnand %p1528_p12, %p2103_p7 }
 0x2fd   : > { %p1534_p13 = por %p1533_p4, %p1532_p6 }
 0x2fe   : > { %p1530_p11 = pneg %p1529_p0 }
 0x300   : > { %p1535_p2 = pnand %p1534_p13, %p1530_p11 }
 0x302   : > { %1538 = shalt.err (!%p1535_p2)
}
 0x303   : > { %s1628_s1 = smov 128   ;;  %s1629_s25 = smov 8   ;;  %v957_v38 = vmul.f32 0.5, %v1370_v37  ;;  %v1372_v39 = vpop.eup %1371 }
 0x304   : > { %1279 = dma.vmem_to_hbm [thread:$0]  (%p2103_p7), %s1964_s28, 256, %s1962_s17, %s1031_s16, %s1628_s1, %s1628_s1, %s1629_s25   ;;  %v1374_v41 = vpop.eup %1373  ;;  %v960_v42 = vmul.f32 0.5, %v1372_v39 }
 0x305   : > { %v963_v40 = vadd.f32 0.5, %v957_v38  ;;  %s460_s29 = scalar_lea.vmem [#allocation11], %s1904_s14  ;;  %v1376_v45 = vpop.eup %1375  ;;  %s1998_s19 = scalar_lea.hbm %s2052_s8, %s1262_s3 }
 0x306   : > { %s1044_s15 = sshll.u32 %s460_s29, 4  ;;  %v966_v44 = vadd.f32 0.5, %v960_v42  ;;  %s1026_s28 = scalar_lea.sflag [#allocation4], %s1901_s0  ;;  %s2000_s15 = int_to_ptr.vmem [resolvable:$true] %s1044_s15 }
 0x307   : > { %v1019_v43 = vmul.f32 %v1374_v41, %v963_v40  ;;  %s1539_s17 = scalar_lea.vmem %s2000_s15, 256  ;;  %s1630_s14 = smov [#allocation11]  }
 0x308   : > { %v1020_v46 = vmul.f32 %v1376_v45, %v966_v44  ;;  %p1540_p3 = scmp.ne.s32.totalorder %s2000_s15, %s1539_s17  ;;  %s1543_s16 = sshll.u32 %s1630_s14, 4  ;;  %s1544_s16 = int_to_ptr.vmem [resolvable:$false] %s1543_s16 }
 0x309   : > { %1021 = vst [vmem:[%s460_s29] sm:$0xff] %v1019_v43  ;;  %s1545_s13 = scalar_lea.vmem %s1544_s16, 512  ;;  %p1546_p10 = scmp.lt.s32.totalorder %s2000_s15, %s1544_s16 }
 0x30a   : > { %1022 = vst [vmem:[%s460_s29 + $0x8] sm:$0xff] %v1020_v46  ;;  %p1541_p8 = pnand %p1540_p3, %p2103_p7  ;;  %p1547_p1 = scmp.lt.s32.totalorder %s1545_s13, %s1539_s17 }
 0x30c   : > { %p1542_p9 = pneg %p1541_p8  ;;  %p1548_p5 = por %p1547_p1, %p1546_p10 }
 0x30e   : > { %p1549_p12 = pnand %p1548_p5, %p1542_p9 }
 0x310   : > { %1552 = shalt.err (!%p1549_p12)
}
 0x311   : > { %s1553_s3 = scalar_lea.hbm %s1998_s19, 256  ;;  %s1557_s18 = scalar_lea.hbm %s2052_s8, 512 }
 0x312   : > { %p1554_p0 = scmp.ne.s32.totalorder %s1998_s19, %s1553_s3  ;;  %p1558_p4 = scmp.lt.s32.totalorder %s1998_s19, %s2052_s8 }
 0x313   : > { %p1559_p13 = scmp.lt.s32.totalorder %s1557_s18, %s1553_s3 }
 0x314   : > { %p1555_p11 = pnand %p1554_p0, %p2103_p7 }
 0x315   : > { %p1560_p2 = por %p1559_p13, %p1558_p4 }
 0x316   : > { %p1556_p6 = pneg %p1555_p11 }
 0x318   : > { %p1561_p3 = pnand %p1560_p2, %p1556_p6 }
 0x31a   : > { %1564 = shalt.err (!%p1561_p3)
}
 0x31b   : > { %1278 = dma.vmem_to_hbm [thread:$0]  (%p2103_p7), %s2000_s15, 256, %s1998_s19, %s1026_s28, %s1628_s1, %s1628_s1, %s1629_s25  }
 0x31c PF: > { %s2104_s12 = sld [smem:[#allocation19_spill]] }
 0x31d   : > { %s2105_s26 = sld [smem:[#allocation23_spill]] }
 0x31e   : > { %s2106_s24 = sld [smem:[#allocation20_spill]] }
 0x322   : > { %s1075_s29 = sand.u32 1, %s2104_s12  }
 0x323   : > { %p2107_p8 = scmp.ne.s32.totalorder %s2105_s26, 0  ;;  %s1076_s27 = scalar_lea.sflag [#allocation4], %s1075_s29 }
 0x324   : > { %p2108_p9 = scmp.ge.s32.totalorder %s2106_s24, 2 }
 0x326   : > { %p1300_p10 = pnand %p2108_p9, %p2107_p8 }
 0x328   : > { %p1301_p1 = pneg %p1300_p10 }
 0x32a   : > { %1594 = dma.done.wait (%p1301_p1), %s1076_s27, 256  }
 0x32b   : > { %1596 = vsyncadd (%p1301_p1), %s1076_s27, 4294967040  ;;  %s1085_s23 = scalar_lea.sflag [#allocation13], %s1075_s29 }
 0x32c   : > { %1598 = dma.done.wait (%p1301_p1), %s1085_s23, 256  }
 0x32d   : > { %1600 = vsyncadd (%p1301_p1), %s1085_s23, 4294967040  ;;  %s2109_s12 = sld [smem:[#allocation21_spill]]  ;;  %s2111_s30 = smov %s1607_s10 }
 0x32e   : > { %s2110_s21 = sld [smem:[#allocation22_spill]]  ;;  %s2112_s10 = smov %s1611_s11 }
 0x333   : > { %p30_p7 = scmp.ge.s32.totalorder %s2109_s12, 4  }
 0x334   : > { %s2113_s11 = smov %s2110_s21 }
 0x335   :  { %32 = sbr.rel (!%p30_p7) target bundleno = 14 (0xe), region = 146 }
 0x33a   :  { %1090 = vsyncpa [#allocation3], 1 }
 0x33b   :  { %1092 = vsyncpa [#allocation3 + $0x1], 1 }
 0x33c   :  { %1093 = vsyncpa [#allocation6], 1 }
 0x33d   :  { %1095 = vsyncpa [#allocation6 + $0x1], 1 }
 0x33e   :  { %1096 = vsyncpa [#allocation9], 1 }
 0x33f   :  { %1097 = vsyncpa [#allocation4], 1 }
 0x340   :  { %1099 = vsyncpa [#allocation4 + $0x1], 1 }
 0x341   :  { %1100 = vsyncpa [#allocation13], 1 }
 0x342   :  { %1102 = vsyncpa [#allocation13 + $0x1], 1 }

// kernel: tpu_custom_call.1
= control target key start
LH: loop header
LB: loop body
LE: loop exit
PB: predicated region body
PF: predicated region fallthrough
CT: control target
= control target key end

     0   :  { %s2044_s0 = inlined_call_operand.hbm [shape: f32[32,128], index: 0, kind: input, shape index: {}]   ;;  %s2045_s1 = inlined_call_operand.hbm [shape: f32[32,128], index: 1, kind: input, shape index: {}]   ;;  %s2046_s2 = inlined_call_operand.hbm [shape: f32[32,128], index: 2, kind: input, shape index: {}]   ;;  %s2047_s3 = inlined_call_operand.hbm [shape: f32[128,512], index: 3, kind: input, shape index: {}]   ;;  %s2048_s4 = inlined_call_operand.hbm [shape: f32[128,512], index: 4, kind: input, shape index: {}]   ;;  %s2049_s5 = inlined_call_operand.vmem [shape: f32[1,512], index: 5, kind: input, shape index: {}]   ;;  %s2050_s6 = inlined_call_operand.vmem [shape: f32[1,128], index: 6, kind: input, shape index: {}]   ;;  %s2051_s7 = inlined_call_operand.vmem [shape: f32[1,128], index: 7, kind: input, shape index: {}]   ;;  %s2052_s8 = inlined_call_operand.hbm [shape: f32[32,128], index: 8, kind: output, shape index: {0}]   ;;  %s2053_s9 = inlined_call_operand.hbm [shape: f32[32,128], index: 9, kind: output, shape index: {1}]  }
   0x1   :  { %2073 = sst [smem:[#allocation24_spill]] %s2044_s0 }
   0x2   :  { %2074 = sst [smem:[#allocation25_spill]] %s2045_s1 }
   0x3   :  { %2075 = sst [smem:[#allocation26_spill]] %s2047_s3 }
   0x4   :  { %15 = vsyncpa [#allocation3], 0 }
   0x5   :  { %17 = vsyncpa [#allocation3 + $0x1], 0 }
   0x6   :  { %18 = vsyncpa [#allocation6], 0 }
   0x7   :  { %20 = vsyncpa [#allocation6 + $0x1], 0 }
   0x8   :  { %21 = vsyncpa [#allocation9], 0 }
   0x9   :  { %22 = vsyncpa [#allocation4], 0 }
   0xa   :  { %24 = vsyncpa [#allocation4 + $0x1], 0 }
   0xb   :  { %25 = vsyncpa [#allocation13], 0 }
   0xc   :  { %27 = vsyncpa [#allocation13 + $0x1], 0  ;;  %s1681_s30 = smov 0   ;;  %s1683_s10 = smov 0  }
   0xd   :  { %s1685_s11 = smov 0   ;;  %s1687_s12 = smov 0  }
   0xe LB: > { %2076 = sst [smem:[#allocation19_spill]] %s1603_s30  ;;  %s1702_s13 = sadd.s32 4294967295, %s1615_s12   ;;  %s1615_s12 = sphi %s1687_s12, %s2109_s12   ;;  %s1611_s11 = sphi %s1685_s11, %s2113_s11   ;;  %s1607_s10 = sphi %s1683_s10, %s2112_s10   ;;  %s1603_s30 = sphi %s1681_s30, %s2111_s30  }
   0xf   : > { %2077 = sst [smem:[#allocation20_spill]] %s1615_s12  ;;  %s1227_s14 = sadd.s32 4294967294, %s1615_s12  }
  0x10   : > { %s1706_s15 = sadd.s32 1, %s1615_s12   ;;  %s40_s16 = sadd.s32 1, %s1611_s11 }
  0x11   : > { %2078 = sst [smem:[#allocation21_spill]] %s1706_s15  ;;  %s37_s17 = ssub.s32 %s1615_s12, %s1706_s15 }
  0x12   : > { %p47_p0 = scmp.ne.s32.totalorder %s1611_s11, %s1607_s10  ;;  %p38_p1 = scmp.eq.s32.totalorder %s37_s17, 0 }
  0x13   : > { %p48_p2 = scmp.eq.s32.totalorder %s1615_s12, 0  ;;  %p53_p3 = scmp.ne.s32.totalorder %s1607_s10, %s1603_s30 }
  0x14   : > { %p2054_p4 = scmp.eq.s32.totalorder %s1702_s13, 0  ;;  %p234_p7 = scmp.eq.s32.totalorder %s1702_s13, 1 }
  0x15   : > { %s1718_s18 = scalar_select %p38_p1, %s1611_s11, %s40_s16  }
  0x16   : > { %p1720_p5 = por %p48_p2, %p47_p0  ;;  %p1726_p6 = por %p2054_p4, %p53_p3 }
  0x17   : > { %2079 = sst [smem:[#allocation22_spill]] %s1718_s18  ;;  %p240_p8 = scmp.eq.s32.totalorder %s1227_s14, 1 }
  0x18   : > { %s2081_s20 = scalar_select %p1726_p6, 1, 0 }
  0x19   : > { %p1228_p9 = scmp.ge.s32.totalorder %s1615_s12, 1  ;;  %p273_p10 = scmp.lt.s32.totalorder %s1615_s12, 3 }
  0x1a   : > { %p1733_p11 = por %p234_p7, %p47_p0  ;;  %p1737_p12 = por %p240_p8, %p53_p3 }
  0x1b   : > { %p1741_p13 = pnand %p1228_p9, %p273_p10  ;;  %s1617_s24 = smov [#allocation8]  }
  0x1c   : > { %s2082_s21 = scalar_select %p1733_p11, 1, 0 }
  0x1d   : > { %s2083_s22 = scalar_select %p1737_p12, 1, 0 }
  0x1e   : > { %s2085_s23 = scalar_select %p1741_p13, 1, 0 }
  0x1f   : > { %2084 = sst [smem:[#allocation23_spill]] %s2083_s22  ;;  %p1282_p1 = pneg %p1741_p13 }
  0x20   : > { %s285_s25 = sshll.u32 %s1617_s24, 4  ;;  %p1308_p3 = scmp.lt.s32.totalorder %s1615_s12, 2  ;;  %s286_s25 = int_to_ptr.vmem [resolvable:$true] %s285_s25 }
  0x21   : > { %p1749_p2 = pnand %p1282_p1, %p2054_p4  ;;  %s2056_s27 = sand.u32 1, %s1611_s11  }
  0x22   : > { %s1758_s28 = sshll.u32 %s2056_s27, 4  ;;  %s1388_s29 = scalar_lea.vmem %s286_s25, 8192 }
  0x23   : > { %s2086_s26 = scalar_select %p1749_p2, 1, 0 }
  0x24   : > { %p2064_p7 = pneg %p1749_p2  ;;  %p1389_p8 = scmp.ne.s32.totalorder %s286_s25, %s1388_s29 }
  0x25   : > { %p1396_p1 = scmp.lt.s32.totalorder %s286_s25, %s286_s25  ;;  %p1397_p4 = scmp.lt.s32.totalorder %s1388_s29, %s1388_s29 }
  0x26   : > { %p1391_p9 = pnand %p1389_p8, %p2064_p7 }
  0x27   : > { %p1398_p12 = por %p1397_p4, %p1396_p1 }
  0x28   : > { %p1392_p10 = pneg %p1391_p9 }
  0x2a   : > { %p1399_p11 = pnand %p1398_p12, %p1392_p10 }
  0x2c   : > { %1402 = shalt.err (!%p1399_p11)
}
  0x2d   : > { %s2061_s14 = smov 512   ;;  %s2062_s16 = smov 32  }
  0x2e   : > { %s2087_s3 = sld [smem:[#allocation26_spill]]  ;;  %s1774_s29 = sshll.u32 %s1615_s12, 8 }
  0x2f   : > { %p1780_p4 = pnand %p1308_p3, %p1720_p5  ;;  %s342_s18 = sand.u32 1, %s1615_s12  }
  0x30   : > { %s2089_s1 = sld [smem:[#allocation25_spill]]  ;;  %s1794_s19 = scalar_lea.sflag [#allocation6], %s342_s18 }
  0x31   : > { %p1800_p11 = pneg %p1780_p4 }
  0x34   : > { %1285 = dma.hbm_to_vmem [thread:$0]  (!%p1749_p2), %s2087_s3, 8192, %s286_s25, [#allocation9], %s2061_s14, %s2061_s14, %s2062_s16  }
  0x35   : > { %s346_s25 = scalar_lea.vmem [#allocation5], %s1758_s28 }
  0x36   : > { %s1789_s30 = scalar_lea.hbm %s2089_s1, %s1774_s29  ;;  %s353_s17 = sshll.u32 %s346_s25, 4  ;;  %s1792_s17 = int_to_ptr.vmem [resolvable:$true] %s353_s17 }
  0x37   : > { %s1403_s24 = scalar_lea.hbm %s1789_s30, 256  ;;  %s1408_s16 = scalar_lea.hbm %s2089_s1, 512 }
  0x38   : > { %p1404_p5 = scmp.ne.s32.totalorder %s1789_s30, %s1403_s24  ;;  %p1409_p8 = scmp.lt.s32.totalorder %s1789_s30, %s2089_s1 }
  0x39   : > { %p1410_p9 = scmp.lt.s32.totalorder %s1408_s16, %s1403_s24 }
  0x3a   : > { %p1406_p12 = pnand %p1800_p11, %p1404_p5 }
  0x3b   : > { %p1411_p10 = por %p1410_p9, %p1409_p8 }
  0x3c   : > { %p1407_p3 = pneg %p1406_p12 }
  0x3e   : > { %p1412_p1 = pnand %p1411_p10, %p1407_p3 }
  0x40   : > { %1415 = shalt.err (!%p1412_p1)
}
  0x41   : > { %s1416_s18 = scalar_lea.vmem %s1792_s17, 256  ;;  %s1620_s12 = smov [#allocation5]  }
  0x42   : > { %p1417_p0 = scmp.ne.s32.totalorder %s1792_s17, %s1416_s18  ;;  %s1421_s15 = sshll.u32 %s1620_s12, 4  ;;  %s1422_s15 = int_to_ptr.vmem [resolvable:$false] %s1421_s15 }
  0x43   : > { %s1423_s22 = scalar_lea.vmem %s1422_s15, 512  ;;  %p1424_p7 = scmp.lt.s32.totalorder %s1792_s17, %s1422_s15 }
  0x44   : > { %p1419_p5 = pnand %p1417_p0, %p1800_p11  ;;  %p1425_p6 = scmp.lt.s32.totalorder %s1423_s22, %s1416_s18 }
  0x46   : > { %p1420_p12 = pneg %p1419_p5  ;;  %p1426_p13 = por %p1425_p6, %p1424_p7 }
  0x48   : > { %p1427_p2 = pnand %p1426_p13, %p1420_p12 }
  0x4a   : > { %1430 = shalt.err (!%p1427_p2)
}
  0x4b   : > { %s2069_s3 = smov 128   ;;  %s2071_s16 = smov 8  }
  0x4c   : > { %1295 = dma.hbm_to_vmem [thread:$0]  (!%p1780_p4), %s1789_s30, 256, %s1792_s17, %s1794_s19, %s2069_s3, %s2069_s3, %s2071_s16  }
  0x4d   : > { %s1623_s12 = smov [#allocation10]   ;;  %p2091_p6 = scmp.ne.s32.totalorder %s2086_s26, 0 }
  0x4e   : > { %s298_s24 = sshll.u32 %s1623_s12, 4  ;;  %s299_s24 = int_to_ptr.vmem [resolvable:$true] %s298_s24 }
  0x4f   : > { %s1442_s25 = scalar_lea.vmem %s299_s24, 8192  ;;  %p2092_p13 = pneg %p2091_p6 }
  0x50   : > { %p1443_p0 = scmp.ne.s32.totalorder %s299_s24, %s1442_s25  ;;  %p1450_p3 = scmp.lt.s32.totalorder %s299_s24, %s299_s24 }
  0x51   : > { %p1451_p8 = scmp.lt.s32.totalorder %s1442_s25, %s1442_s25 }
  0x52   : > { %p1445_p2 = pnand %p1443_p0, %p2092_p13 }
  0x53   : > { %p1452_p9 = por %p1451_p8, %p1450_p3 }
  0x54   : > { %p1446_p7 = pneg %p1445_p2 }
  0x56   : > { %p1453_p10 = pnand %p1452_p9, %p1446_p7 }
  0x58   : > { %1456 = shalt.err (!%p1453_p10)
}
  0x59   : > { %s2093_s18 = smov 32   ;;  %s2094_s15 = smov 512  }
  0x5a   : > { %1288 = dma.hbm_to_vmem [thread:$0]  (!%p2091_p6), %s2048_s4, 8192, %s299_s24, [#allocation9], %s2094_s15, %s2094_s15, %s2093_s18  }
  0x5b   : > { %s2095_s0 = sld [smem:[#allocation24_spill]]  ;;  %s325_s26 = scalar_lea.vmem [#allocation2], %s1758_s28 }
  0x5c   : > { %s332_s3 = sshll.u32 %s325_s26, 4  ;;  %s2096_s16 = sand.u32 1, %s1611_s11   ;;  %s1844_s3 = int_to_ptr.vmem [resolvable:$true] %s332_s3 }
  0x5d   : > { %s322_s1 = scalar_lea.sflag [#allocation3], %s2096_s16 }
  0x61   : > { %s1841_s25 = scalar_lea.hbm %s2095_s0, %s1774_s29  ;;  %s1462_s15 = scalar_lea.hbm %s2095_s0, 512 }
  0x62   : > { %s1457_s30 = scalar_lea.hbm %s1841_s25, 256  ;;  %p1463_p0 = scmp.lt.s32.totalorder %s1841_s25, %s2095_s0 }
  0x63   : > { %p1458_p1 = scmp.ne.s32.totalorder %s1841_s25, %s1457_s30  ;;  %p1464_p6 = scmp.lt.s32.totalorder %s1462_s15, %s1457_s30 }
  0x65   : > { %p1460_p5 = pnand %p1458_p1, %p1800_p11  ;;  %p1465_p13 = por %p1464_p6, %p1463_p0 }
  0x67   : > { %p1461_p12 = pneg %p1460_p5 }
  0x69   : > { %p1466_p2 = pnand %p1465_p13, %p1461_p12 }
  0x6b   : > { %1469 = shalt.err (!%p1466_p2)
}
  0x6c   : > { %s1470_s16 = scalar_lea.vmem %s1844_s3, 256  ;;  %s1624_s12 = smov [#allocation2]  }
  0x6d   : > { %p1471_p7 = scmp.ne.s32.totalorder %s1844_s3, %s1470_s16  ;;  %s1475_s26 = sshll.u32 %s1624_s12, 4  ;;  %s1476_s26 = int_to_ptr.vmem [resolvable:$false] %s1475_s26 }
  0x6e   : > { %s1477_s24 = scalar_lea.vmem %s1476_s26, 512  ;;  %p1478_p9 = scmp.lt.s32.totalorder %s1844_s3, %s1476_s26 }
  0x6f   : > { %p1473_p3 = pnand %p1471_p7, %p1800_p11  ;;  %p1479_p10 = scmp.lt.s32.totalorder %s1477_s24, %s1470_s16 }
  0x71   : > { %p1474_p8 = pneg %p1473_p3  ;;  %p1480_p1 = por %p1479_p10, %p1478_p9 }
  0x73   : > { %p1481_p5 = pnand %p1480_p1, %p1474_p8 }
  0x75   : > { %1484 = shalt.err (!%p1481_p5)
}
  0x76   : > { %s2097_s30 = smov 8   ;;  %s2098_s18 = smov 128  }
  0x77   : > { %1292 = dma.hbm_to_vmem [thread:$0]  (!%p1780_p4), %s1841_s25, 256, %s1844_s3, %s322_s1, %s2098_s18, %s2098_s18, %s2097_s30  }
  0x78   : > { %s1875_s22 = scalar_lea.hbm %s2046_s2, %s1774_s29  ;;  %s367_s16 = scalar_lea.vmem [#allocation7], %s1758_s28 }
  0x79   : > { %s374_s12 = sshll.u32 %s367_s16, 4  ;;  %s1485_s26 = scalar_lea.hbm %s1875_s22, 256  ;;  %s375_s12 = int_to_ptr.vmem [resolvable:$true] %s374_s12 }
  0x7a   : > { %p1486_p12 = scmp.ne.s32.totalorder %s1875_s22, %s1485_s26  ;;  %s1490_s1 = scalar_lea.hbm %s2046_s2, 512 }
  0x7b   : > { %p1491_p13 = scmp.lt.s32.totalorder %s1875_s22, %s2046_s2  ;;  %p1492_p2 = scmp.lt.s32.totalorder %s1490_s1, %s1485_s26 }
  0x7c   : > { %p1488_p0 = pnand %p1486_p12, %p1800_p11 }
  0x7d   : > { %p1493_p7 = por %p1492_p2, %p1491_p13 }
  0x7e   : > { %p1489_p6 = pneg %p1488_p0 }
  0x80   : > { %p1494_p3 = pnand %p1493_p7, %p1489_p6 }
  0x82   : > { %1497 = shalt.err (!%p1494_p3)
}
  0x83   : > { %s1498_s28 = scalar_lea.vmem %s375_s12, 256  ;;  %s1625_s29 = smov [#allocation7]  }
  0x84   : > { %p1499_p8 = scmp.ne.s32.totalorder %s375_s12, %s1498_s28  ;;  %s1503_s15 = sshll.u32 %s1625_s29, 4  ;;  %s1504_s15 = int_to_ptr.vmem [resolvable:$false] %s1503_s15 }
  0x85   : > { %s1505_s17 = scalar_lea.vmem %s1504_s15, 512  ;;  %p1506_p1 = scmp.lt.s32.totalorder %s375_s12, %s1504_s15 }
  0x86   : > { %p1501_p9 = pnand %p1499_p8, %p1800_p11  ;;  %p1507_p5 = scmp.lt.s32.totalorder %s1505_s17, %s1498_s28 }
  0x88   : > { %p1502_p10 = pneg %p1501_p9  ;;  %p1508_p12 = por %p1507_p5, %p1506_p1 }
  0x8a   : > { %p1509_p0 = pnand %p1508_p12, %p1502_p10 }
  0x8c   : > { %1512 = shalt.err (!%p1509_p0)
}
  0x8d   : > { %1298 = dma.hbm_to_vmem [thread:$0]  (!%p1780_p4), %s1875_s22, 256, %s375_s12, %s1794_s19, %s2098_s18, %s2098_s18, %s2097_s30  }
  0x8e   : > { %p2099_p11 = scmp.ne.s32.totalorder %s2085_s23, 0 }
  0x8f   : > { %s1901_s0 = sand.u32 (!%p2099_p11), 1, %s1607_s10   ;;  %p2100_p6 = scmp.ne.s32.totalorder (!%p2099_p11), %s2081_s20, 0 }
  0x90   : > { %386 = sbr.rel (%p2099_p11) target bundleno = 796 (0x31c), region = 52  ;;  %s1904_s14 = sshll.u32 (!%p2099_p11), %s1901_s0, 4 }
  0x91   : > { %s389_s16 = scalar_lea.sflag (!%p2099_p11), [#allocation3], %s1901_s0  ;;  %s392_s27 = scalar_lea.vmem (!%p2099_p11), [#allocation2], %s1904_s14 }
  0x95   : > { %1582 = dma.done.wait (%p2100_p6), %s389_s16, 256  }
  0x96   : > { %1584 = vsyncadd (%p2100_p6), %s389_s16, 4294967040  ;;  %s397_s23 = sand.u32 1, %s1702_s13   ;;  %s401_s30 = scalar_lea.vmem [#allocation5], %s1904_s14 }
  0x97   : > { %s398_s19 = scalar_lea.sflag [#allocation6], %s397_s23 }
  0x98   : > { %1586 = dma.done.wait (%p2100_p6), %s398_s19, 512  }
  0x99   : > { %1588 = vsyncadd (%p2100_p6), %s398_s19, 4294966784  ;;  %s410_s18 = scalar_lea.vmem [#allocation7], %s1904_s14  ;;  %p2101_p4 = scmp.eq.s32.totalorder %s1702_s13, 0 }
  0x9b   : > { %1590 = dma.done.wait (%p2101_p4), [#allocation9], 16384   ;;  %p2102_p13 = pmov %p2101_p4 }
  0x9c   : > { %v1626_v0 = vmov 0.0   ;;  %v602_v1 = vld [vmem:[#allocation10 + $0x1e8] sm:$0xff]  ;;  %v604_v2 = vld [vmem:[#allocation10 + $0x1f8] sm:$0xff]  ;;  %v601_v3 = vld [vmem:[#allocation10 + $0x1e0] sm:$0xff]  ;;  %s1262_s3 = sshll.u32 %s1702_s13, 8  ;;  %s467_s25 = scalar_lea.vmem [#allocation12], %s1904_s14 }
  0x9d   : > { %1592 = vsyncadd (%p2102_p13), [#allocation9], 4294950912  ;;  %669 = vmatprep.mubr.f32.mxu0 %v1626_v0  ;;  %746 = vmatprep.mubr.f32.mxu1 %v1626_v0  ;;  %v603_v4 = vld [vmem:[#allocation10 + $0x1f0] sm:$0xff]  ;;  %v598_v5 = vld [vmem:[#allocation10 + $0x1c8] sm:$0xff]  ;;  %s1060_s28 = sshll.u32 %s467_s25, 4  ;;  %s1962_s17 = scalar_lea.hbm %s2053_s9, %s1262_s3  ;;  %s1964_s28 = int_to_ptr.vmem [resolvable:$true] %s1060_s28 }
  0x9e   : > { %605 = vmatprep.subr.mxu0 %v602_v1  ;;  %682 = vmatprep.subr.mxu1 %v604_v2  ;;  %v600_v6 = vld [vmem:[#allocation10 + $0x1d8] sm:$0xff]  ;;  %v597_v7 = vld [vmem:[#allocation10 + $0x1c0] sm:$0xff]  ;;  %v599_v8 = vld [vmem:[#allocation10 + $0x1d0] sm:$0xff]  ;;  %s1031_s16 = scalar_lea.sflag [#allocation13], %s1901_s0  ;;  %p2103_p7 = scmp.ne.s32.totalorder %s2082_s21, 0 }
  0x9f   : > { %606 = vmatpush1.msra.mxu0 %v601_v3  ;;  %683 = vmatpush1.msra.mxu1 %v603_v4  ;;  %v594_v9 = vld [vmem:[#allocation10 + $0x1a8] sm:$0xff]  ;;  %v596_v10 = vld [vmem:[#allocation10 + $0x1b8] sm:$0xff]  ;;  %v593_v11 = vld [vmem:[#allocation10 + $0x1a0] sm:$0xff]  ;;  %s1627_s23 = smov [#allocation12]  }
  0xa0   : > { %607 = vmatprep.subr.mxu0 %v598_v5  ;;  %684 = vmatprep.subr.mxu1 %v600_v6  ;;  %v595_v12 = vld [vmem:[#allocation10 + $0x1b0] sm:$0xff]  ;;  %v590_v13 = vld [vmem:[#allocation10 + $0x188] sm:$0xff]  ;;  %v592_v14 = vld [vmem:[#allocation10 + $0x198] sm:$0xff]  ;;  %s1517_s19 = sshll.u32 %s1627_s23, 4  ;;  %s1518_s19 = int_to_ptr.vmem [resolvable:$false] %s1517_s19 }
  0xa1   : > { %608 = vmatpush1.msra.mxu0 %v597_v7  ;;  %685 = vmatpush1.msra.mxu1 %v599_v8  ;;  %v589_v15 = vld [vmem:[#allocation10 + $0x180] sm:$0xff]  ;;  %v591_v16 = vld [vmem:[#allocation10 + $0x190] sm:$0xff]  ;;  %v586_v17 = vld [vmem:[#allocation10 + $0x168] sm:$0xff]  ;;  %p1520_p9 = scmp.lt.s32.totalorder %s1964_s28, %s1518_s19 }
  0xa2   : > { %609 = vmatprep.subr.mxu0 %v594_v9  ;;  %686 = vmatprep.subr.mxu1 %v596_v10  ;;  %v588_v18 = vld [vmem:[#allocation10 + $0x178] sm:$0xff]  ;;  %v585_v19 = vld [vmem:[#allocation10 + $0x160] sm:$0xff]  ;;  %v587_v20 = vld [vmem:[#allocation10 + $0x170] sm:$0xff] }
  0xa3   : > { %610 = vmatpush1.msra.mxu0 %v593_v11  ;;  %687 = vmatpush1.msra.mxu1 %v595_v12  ;;  %v582_v21 = vld [vmem:[#allocation10 + $0x148] sm:$0xff]  ;;  %v584_v22 = vld [vmem:[#allocation10 + $0x158] sm:$0xff]  ;;  %v581_v23 = vld [vmem:[#allocation10 + $0x140] sm:$0xff] }
  0xa4   : > { %611 = vmatprep.subr.mxu0 %v590_v13  ;;  %688 = vmatprep.subr.mxu1 %v592_v14  ;;  %v583_v24 = vld [vmem:[#allocation10 + $0x150] sm:$0xff]  ;;  %v578_v25 = vld [vmem:[#allocation10 + $0x128] sm:$0xff]  ;;  %v580_v26 = vld [vmem:[#allocation10 + $0x138] sm:$0xff] }
  0xa5   : > { %612 = vmatpush1.msra.mxu0 %v589_v15  ;;  %689 = vmatpush1.msra.mxu1 %v591_v16  ;;  %v577_v27 = vld [vmem:[#allocation10 + $0x120] sm:$0xff]  ;;  %v579_v28 = vld [vmem:[#allocation10 + $0x130] sm:$0xff]  ;;  %v574_v29 = vld [vmem:[#allocation10 + $0x108] sm:$0xff] }
  0xa6   : > { %613 = vmatprep.subr.mxu0 %v586_v17  ;;  %690 = vmatprep.subr.mxu1 %v588_v18  ;;  %v576_v30 = vld [vmem:[#allocation10 + $0x118] sm:$0xff]  ;;  %v573_v31 = vld [vmem:[#allocation10 + $0x100] sm:$0xff]  ;;  %v575_v32 = vld [vmem:[#allocation10 + $0x110] sm:$0xff] }
  0xa7   : > { %614 = vmatpush1.msra.mxu0 %v585_v19  ;;  %691 = vmatpush1.msra.mxu1 %v587_v20  ;;  %v570_v33 = vld [vmem:[#allocation10 + $0xe8] sm:$0xff]  ;;  %v572_v34 = vld [vmem:[#allocation10 + $0xf8] sm:$0xff]  ;;  %v569_v35 = vld [vmem:[#allocation10 + $0xe0] sm:$0xff] }
  0xa8   : > { %615 = vmatprep.subr.mxu0 %v582_v21  ;;  %692 = vmatprep.subr.mxu1 %v584_v22  ;;  %v571_v36 = vld [vmem:[#allocation10 + $0xf0] sm:$0xff]  ;;  %v566_v37 = vld [vmem:[#allocation10 + $0xc8] sm:$0xff]  ;;  %v568_v38 = vld [vmem:[#allocation10 + $0xd8] sm:$0xff] }
  0xa9   : > { %616 = vmatpush1.msra.mxu0 %v581_v23  ;;  %693 = vmatpush1.msra.mxu1 %v583_v24  ;;  %v565_v39 = vld [vmem:[#allocation10 + $0xc0] sm:$0xff]  ;;  %v567_v40 = vld [vmem:[#allocation10 + $0xd0] sm:$0xff]  ;;  %v562_v41 = vld [vmem:[#allocation10 + $0xa8] sm:$0xff] }
  0xaa   : > { %617 = vmatprep.subr.mxu0 %v578_v25  ;;  %694 = vmatprep.subr.mxu1 %v580_v26  ;;  %v564_v42 = vld [vmem:[#allocation10 + $0xb8] sm:$0xff]  ;;  %v561_v43 = vld [vmem:[#allocation10 + $0xa0] sm:$0xff]  ;;  %v563_v44 = vld [vmem:[#allocation10 + $0xb0] sm:$0xff] }
  0xab   : > { %618 = vmatpush1.msra.mxu0 %v577_v27  ;;  %695 = vmatpush1.msra.mxu1 %v579_v28  ;;  %v558_v45 = vld [vmem:[#allocation10 + $0x88] sm:$0xff]  ;;  %v560_v46 = vld [vmem:[#allocation10 + $0x98] sm:$0xff]  ;;  %v557_v47 = vld [vmem:[#allocation10 + $0x80] sm:$0xff] }
  0xac   : > { %619 = vmatprep.subr.mxu0 %v574_v29  ;;  %696 = vmatprep.subr.mxu1 %v576_v30  ;;  %v559_v48 = vld [vmem:[#allocation10 + $0x90] sm:$0xff]  ;;  %v554_v49 = vld [vmem:[#allocation10 + $0x68] sm:$0xff]  ;;  %v556_v50 = vld [vmem:[#allocation10 + $0x78] sm:$0xff] }
  0xad   : > { %620 = vmatpush1.msra.mxu0 %v573_v31  ;;  %697 = vmatpush1.msra.mxu1 %v575_v32  ;;  %v553_v51 = vld [vmem:[#allocation10 + $0x60] sm:$0xff]  ;;  %v555_v52 = vld [vmem:[#allocation10 + $0x70] sm:$0xff]  ;;  %v550_v53 = vld [vmem:[#allocation10 + $0x48] sm:$0xff] }
  0xae   : > { %621 = vmatprep.subr.mxu0 %v570_v33  ;;  %698 = vmatprep.subr.mxu1 %v572_v34  ;;  %v552_v54 = vld [vmem:[#allocation10 + $0x58] sm:$0xff]  ;;  %v549_v55 = vld [vmem:[#allocation10 + $0x40] sm:$0xff]  ;;  %v551_v56 = vld [vmem:[#allocation10 + $0x50] sm:$0xff] }
  0xaf   : > { %622 = vmatpush1.msra.mxu0 %v569_v35  ;;  %699 = vmatpush1.msra.mxu1 %v571_v36  ;;  %v546_v57 = vld [vmem:[#allocation10 + $0x28] sm:$0xff]  ;;  %v548_v58 = vld [vmem:[#allocation10 + $0x38] sm:$0xff]  ;;  %v545_v59 = vld [vmem:[#allocation10 + $0x20] sm:$0xff] }
  0xb0   : > { %623 = vmatprep.subr.mxu0 %v566_v37  ;;  %700 = vmatprep.subr.mxu1 %v568_v38  ;;  %v547_v60 = vld [vmem:[#allocation10 + $0x30] sm:$0xff]  ;;  %v542_v61 = vld [vmem:[#allocation10 + $0x8] sm:$0xff]  ;;  %v544_v62 = vld [vmem:[#allocation10 + $0x18] sm:$0xff] }
  0xb1   : > { %624 = vmatpush1.msra.mxu0 %v565_v39  ;;  %701 = vmatpush1.msra.mxu1 %v567_v40  ;;  %v541_v63 = vld [vmem:[#allocation10] sm:$0xff]  ;;  %v543_v1 = vld [vmem:[#allocation10 + $0x10] sm:$0xff]  ;;  %v536_v3 = vld [vmem:[#allocation8 + $0x1e8] sm:$0xff] }
  0xb2   : > { %625 = vmatprep.subr.mxu0 %v562_v41  ;;  %702 = vmatprep.subr.mxu1 %v564_v42  ;;  %v539_v2 = vld [vmem:[%s401_s30] sm:$0xff]  ;;  %v538_v4 = vld [vmem:[#allocation8 + $0x1f8] sm:$0xff]  ;;  %v532_v7 = vld [vmem:[#allocation8 + $0x1c8] sm:$0xff] }
  0xb3   : > { %626 = vmatpush1.msra.mxu0 %v561_v43  ;;  %703 = vmatpush1.msra.mxu1 %v563_v44  ;;  %v535_v5 = vld [vmem:[#allocation8 + $0x1e0] sm:$0xff]  ;;  %v537_v6 = vld [vmem:[#allocation8 + $0x1f0] sm:$0xff]  ;;  %v534_v8 = vld [vmem:[#allocation8 + $0x1d8] sm:$0xff] }
  0xb4   : > { %627 = vmatprep.subr.mxu0 %v558_v45  ;;  %704 = vmatprep.subr.mxu1 %v560_v46  ;;  %v531_v9 = vld [vmem:[#allocation8 + $0x1c0] sm:$0xff]  ;;  %v533_v10 = vld [vmem:[#allocation8 + $0x1d0] sm:$0xff]  ;;  %v528_v11 = vld [vmem:[#allocation8 + $0x1a8] sm:$0xff] }
  0xb5   : > { %628 = vmatpush1.msra.mxu0 %v557_v47  ;;  %705 = vmatpush1.msra.mxu1 %v559_v48  ;;  %v530_v12 = vld [vmem:[#allocation8 + $0x1b8] sm:$0xff]  ;;  %v527_v13 = vld [vmem:[#allocation8 + $0x1a0] sm:$0xff]  ;;  %v529_v14 = vld [vmem:[#allocation8 + $0x1b0] sm:$0xff] }
  0xb6   : > { %629 = vmatprep.subr.mxu0 %v554_v49  ;;  %706 = vmatprep.subr.mxu1 %v556_v50  ;;  %v524_v15 = vld [vmem:[#allocation8 + $0x188] sm:$0xff]  ;;  %v526_v16 = vld [vmem:[#allocation8 + $0x198] sm:$0xff]  ;;  %v523_v17 = vld [vmem:[#allocation8 + $0x180] sm:$0xff] }
  0xb7   : > { %630 = vmatpush1.msra.mxu0 %v553_v51  ;;  %707 = vmatpush1.msra.mxu1 %v555_v52  ;;  %v525_v18 = vld [vmem:[#allocation8 + $0x190] sm:$0xff]  ;;  %v520_v19 = vld [vmem:[#allocation8 + $0x168] sm:$0xff]  ;;  %v522_v20 = vld [vmem:[#allocation8 + $0x178] sm:$0xff] }
  0xb8   : > { %631 = vmatprep.subr.mxu0 %v550_v53  ;;  %708 = vmatprep.subr.mxu1 %v552_v54  ;;  %v519_v21 = vld [vmem:[#allocation8 + $0x160] sm:$0xff]  ;;  %v521_v22 = vld [vmem:[#allocation8 + $0x170] sm:$0xff]  ;;  %v516_v23 = vld [vmem:[#allocation8 + $0x148] sm:$0xff] }
  0xb9   : > { %632 = vmatpush1.msra.mxu0 %v549_v55  ;;  %709 = vmatpush1.msra.mxu1 %v551_v56  ;;  %v518_v24 = vld [vmem:[#allocation8 + $0x158] sm:$0xff]  ;;  %v515_v25 = vld [vmem:[#allocation8 + $0x140] sm:$0xff]  ;;  %v517_v26 = vld [vmem:[#allocation8 + $0x150] sm:$0xff] }
  0xba   : > { %633 = vmatprep.subr.mxu0 %v546_v57  ;;  %710 = vmatprep.subr.mxu1 %v548_v58  ;;  %v512_v27 = vld [vmem:[#allocation8 + $0x128] sm:$0xff]  ;;  %v514_v28 = vld [vmem:[#allocation8 + $0x138] sm:$0xff]  ;;  %v511_v29 = vld [vmem:[#allocation8 + $0x120] sm:$0xff] }
  0xbb   : > { %634 = vmatpush1.msra.mxu0 %v545_v59  ;;  %711 = vmatpush1.msra.mxu1 %v547_v60  ;;  %v513_v30 = vld [vmem:[#allocation8 + $0x130] sm:$0xff]  ;;  %v508_v31 = vld [vmem:[#allocation8 + $0x108] sm:$0xff]  ;;  %v510_v32 = vld [vmem:[#allocation8 + $0x118] sm:$0xff] }
  0xbc   : > { %635 = vmatprep.subr.mxu0 %v542_v61  ;;  %712 = vmatprep.subr.mxu1 %v544_v62  ;;  %v507_v33 = vld [vmem:[#allocation8 + $0x100] sm:$0xff]  ;;  %v509_v34 = vld [vmem:[#allocation8 + $0x110] sm:$0xff]  ;;  %v504_v35 = vld [vmem:[#allocation8 + $0xe8] sm:$0xff] }
  0xbd   : > { %636 = vmatpush1.msra.mxu0 %v541_v63  ;;  %713 = vmatpush1.msra.mxu1 %v543_v1  ;;  %v506_v36 = vld [vmem:[#allocation8 + $0xf8] sm:$0xff]  ;;  %v503_v37 = vld [vmem:[#allocation8 + $0xe0] sm:$0xff]  ;;  %v505_v38 = vld [vmem:[#allocation8 + $0xf0] sm:$0xff] }
  0xbe   : > { %670 = vmatmul.mubr.f32.vlgmr.msra.gmra.mxu0 %v539_v2  ;;  %759 = vmatprep.subr.mxu0 %v536_v3  ;;  %v500_v39 = vld [vmem:[#allocation8 + $0xc8] sm:$0xff]  ;;  %v502_v40 = vld [vmem:[#allocation8 + $0xd8] sm:$0xff]  ;;  %v499_v41 = vld [vmem:[#allocation8 + $0xc0] sm:$0xff] }
  0xbf   : > { %836 = vmatprep.subr.mxu1 %v538_v4  ;;  %747 = vmatmul.mubr.f32.vlgmr.msra.gmra.mxu1 %v539_v2  ;;  %v501_v42 = vld [vmem:[#allocation8 + $0xd0] sm:$0xff]  ;;  %v496_v43 = vld [vmem:[#allocation8 + $0xa8] sm:$0xff]  ;;  %v498_v44 = vld [vmem:[#allocation8 + $0xb8] sm:$0xff] }
  0xc0   : > { %760 = vmatpush1.msra.mxu0 %v535_v5  ;;  %837 = vmatpush1.msra.mxu1 %v537_v6  ;;  %v495_v45 = vld [vmem:[#allocation8 + $0xa0] sm:$0xff]  ;;  %v497_v46 = vld [vmem:[#allocation8 + $0xb0] sm:$0xff]  ;;  %v492_v47 = vld [vmem:[#allocation8 + $0x88] sm:$0xff] }
  0xc1   : > { %761 = vmatprep.subr.mxu0 %v532_v7  ;;  %838 = vmatprep.subr.mxu1 %v534_v8  ;;  %v494_v48 = vld [vmem:[#allocation8 + $0x98] sm:$0xff]  ;;  %v491_v49 = vld [vmem:[#allocation8 + $0x80] sm:$0xff]  ;;  %v493_v50 = vld [vmem:[#allocation8 + $0x90] sm:$0xff]  ;;  %v915_v7 = vlaneseq }
  0xc2   : > { %762 = vmatpush1.msra.mxu0 %v531_v9  ;;  %839 = vmatpush1.msra.mxu1 %v533_v10  ;;  %v488_v51 = vld [vmem:[#allocation8 + $0x68] sm:$0xff]  ;;  %v490_v52 = vld [vmem:[#allocation8 + $0x78] sm:$0xff]  ;;  %v487_v53 = vld [vmem:[#allocation8 + $0x60] sm:$0xff] }
  0xc3   : > { %763 = vmatprep.subr.mxu0 %v528_v11  ;;  %840 = vmatprep.subr.mxu1 %v530_v12  ;;  %v489_v54 = vld [vmem:[#allocation8 + $0x70] sm:$0xff]  ;;  %v540_v55 = vld [vmem:[%s401_s30 + $0x8] sm:$0xff]  ;;  %v483_v58 = vld [vmem:[#allocation8 + $0x40] sm:$0xff]  ;;  %v916_v8 = vshrl.u32 %v915_v7, 7  ;;  %s1519_s30 = scalar_lea.vmem %s1518_s19, 512 }
  0xc4   : > { %764 = vmatpush1.msra.mxu0 %v527_v13  ;;  %841 = vmatpush1.msra.mxu1 %v529_v14  ;;  %v484_v56 = vld [vmem:[#allocation8 + $0x48] sm:$0xff]  ;;  %v486_v57 = vld [vmem:[#allocation8 + $0x58] sm:$0xff]  ;;  %v485_v59 = vld [vmem:[#allocation8 + $0x50] sm:$0xff] }
  0xc5   : > { %765 = vmatprep.subr.mxu0 %v524_v15  ;;  %842 = vmatprep.subr.mxu1 %v526_v16  ;;  %v480_v60 = vld [vmem:[#allocation8 + $0x28] sm:$0xff]  ;;  %v482_v61 = vld [vmem:[#allocation8 + $0x38] sm:$0xff]  ;;  %v479_v62 = vld [vmem:[#allocation8 + $0x20] sm:$0xff]  ;;  %v925_v9 = vsub.s32 2, %v916_v8 }
  0xc6   : > { %766 = vmatpush1.msra.mxu0 %v523_v17  ;;  %843 = vmatpush1.msra.mxu1 %v525_v18  ;;  %v481_v63 = vld [vmem:[#allocation8 + $0x30] sm:$0xff]  ;;  %v476_v1 = vld [vmem:[#allocation8 + $0x8] sm:$0xff]  ;;  %v478_v2 = vld [vmem:[#allocation8 + $0x18] sm:$0xff]  ;;  %v917_v18 = vsub.s32 0, %v916_v8 }
  0xc7   : > { %767 = vmatprep.subr.mxu0 %v520_v19  ;;  %844 = vmatprep.subr.mxu1 %v522_v20  ;;  %v475_v3 = vld [vmem:[#allocation8] sm:$0xff]  ;;  %v477_v4 = vld [vmem:[#allocation8 + $0x10] sm:$0xff]  ;;  %v474_v6 = vld [vmem:[%s392_s27 + $0x8] sm:$0xff]  ;;  %v921_v19 = vsub.s32 1, %v916_v8 }
  0xc8   : > { %768 = vmatpush1.msra.mxu0 %v519_v21  ;;  %845 = vmatpush1.msra.mxu1 %v521_v22  ;;  %v473_v5 = vld [vmem:[%s392_s27] sm:$0xff]  ;;  %s1513_s27 = scalar_lea.vmem %s1964_s28, 256 }
  0xc9   : > { %769 = vmatprep.subr.mxu0 %v516_v23  ;;  %846 = vmatprep.subr.mxu1 %v518_v24  ;;  %v913_v10 = vld [vmem:[%s2049_s5] sm:$0xf]  ;;  %p1514_p2 = scmp.ne.s32.totalorder %s1964_s28, %s1513_s27  ;;  %p1521_p10 = scmp.lt.s32.totalorder %s1519_s30, %s1513_s27 }
  0xca   : > { %770 = vmatpush1.msra.mxu0 %v515_v25  ;;  %847 = vmatpush1.msra.mxu1 %v517_v26  ;;  %v926_v11 = vrot.slane %v913_v10, %v925_v9  ;;  %v918_v21 = vrot.slane %v913_v10, %v917_v18  ;;  %v922_v26 = vrot.slane %v913_v10, %v921_v19 }
  0xcb   : > { %771 = vmatprep.subr.mxu0 %v512_v27  ;;  %848 = vmatprep.subr.mxu1 %v514_v28  ;;  %v929_v27 = vsub.s32 3, %v916_v8  ;;  %p1515_p3 = pnand %p1514_p2, %p2103_p7  ;;  %p1522_p1 = por %p1521_p10, %p1520_p9 }
  0xcc   : > { %772 = vmatpush1.msra.mxu0 %v511_v29  ;;  %849 = vmatpush1.msra.mxu1 %v513_v30 }
  0xcd   : > { %773 = vmatprep.subr.mxu0 %v508_v31  ;;  %850 = vmatprep.subr.mxu1 %v510_v32  ;;  %p1516_p8 = pneg %p1515_p3 }
  0xce   : > { %774 = vmatpush1.msra.mxu0 %v507_v33  ;;  %851 = vmatpush1.msra.mxu1 %v509_v34 }
  0xcf   : > { %775 = vmatprep.subr.mxu0 %v504_v35  ;;  %852 = vmatprep.subr.mxu1 %v506_v36  ;;  %p1523_p5 = pnand %p1522_p1, %p1516_p8 }
  0xd0   : > { %776 = vmatpush1.msra.mxu0 %v503_v37  ;;  %853 = vmatpush1.msra.mxu1 %v505_v38  ;;  %v930_v38 = vrot.slane %v913_v10, %v929_v27 }
  0xd1   : > { %777 = vmatprep.subr.mxu0 %v500_v39  ;;  %854 = vmatprep.subr.mxu1 %v502_v40 }
  0xd2   : > { %778 = vmatpush1.msra.mxu0 %v499_v41  ;;  %855 = vmatpush1.msra.mxu1 %v501_v42 }
  0xd3   : > { %779 = vmatprep.subr.mxu0 %v496_v43  ;;  %856 = vmatprep.subr.mxu1 %v498_v44 }
  0xd4   : > { %780 = vmatpush1.msra.mxu0 %v495_v45  ;;  %857 = vmatpush1.msra.mxu1 %v497_v46 }
  0xd5   : > { %781 = vmatprep.subr.mxu0 %v492_v47  ;;  %858 = vmatprep.subr.mxu1 %v494_v48 }
  0xd6   : > { %782 = vmatpush1.msra.mxu0 %v491_v49  ;;  %859 = vmatpush1.msra.mxu1 %v493_v50 }
  0xd7   : > { %783 = vmatprep.subr.mxu0 %v488_v51  ;;  %860 = vmatprep.subr.mxu1 %v490_v52 }
  0xd8   : > { %675 = vmatprep.mubr.f32.mxu0 %v1626_v0  ;;  %784 = vmatpush1.msra.mxu0 %v487_v53 }
  0xd9   : > { %861 = vmatpush1.msra.mxu1 %v489_v54  ;;  %676 = vmatmul.mubr.f32.gmra.mxu0 %v540_v55 }
  0xda   : > { %785 = vmatprep.subr.mxu0 %v484_v56  ;;  %862 = vmatprep.subr.mxu1 %v486_v57 }
  0xdb   : > { %752 = vmatprep.mubr.f32.mxu1 %v1626_v0  ;;  %786 = vmatpush1.msra.mxu0 %v483_v58  ;;  %v969_v58 = vld [vmem:[%s410_s18] sm:$0xff] }
  0xdc   : > { %863 = vmatpush1.msra.mxu1 %v485_v59  ;;  %787 = vmatprep.subr.mxu0 %v480_v60 }
  0xdd   : > { %753 = vmatmul.mubr.f32.gmra.mxu1 %v540_v55  ;;  %864 = vmatprep.subr.mxu1 %v482_v61 }
  0xde   : > { %788 = vmatpush1.msra.mxu0 %v479_v62  ;;  %865 = vmatpush1.msra.mxu1 %v481_v63 }
  0xdf   : > { %789 = vmatprep.subr.mxu0 %v476_v1  ;;  %866 = vmatprep.subr.mxu1 %v478_v2 }
  0xe0   : > { %790 = vmatpush1.msra.mxu0 %v475_v3  ;;  %823 = vmatprep.mubr.f32.mxu0 %v1626_v0 }
  0xe1   : > { %867 = vmatpush1.msra.mxu1 %v477_v4  ;;  %900 = vmatprep.mubr.f32.mxu1 %v1626_v0 }
  0xe2   : > { %824 = vmatmul.mubr.f32.vlgmr.msra.gmra.mxu0 %v473_v5  ;;  %901 = vmatmul.mubr.f32.vlgmr.msra.gmra.mxu1 %v473_v5 }
  0xe3   : > { %829 = vmatprep.mubr.f32.mxu0 %v1626_v0  ;;  %906 = vmatprep.mubr.f32.mxu1 %v1626_v0 }
  0xe6   : > { %830 = vmatmul.mubr.f32.gmra.mxu0 %v474_v6  ;;  %907 = vmatmul.mubr.f32.gmra.mxu1 %v474_v6  ;;  %v970_v6 = vld [vmem:[%s410_s18 + $0x8] sm:$0xff] }
 0x17e   : > { %v671_v12 = vpop.f32.mrf.mxu0 }
 0x17f   : > { %v748_v13 = vpop.f32.mrf.mxu1 }
 0x180   : > { %v673_v14 = vpop.f32.mrf.mxu0 }
 0x181   : > { %v750_v15 = vpop.f32.mrf.mxu1 }
 0x199   : > { %v677_v16 = vpop.f32.mrf.mxu0 }
 0x19b   : > { %v679_v20 = vpop.f32.mrf.mxu0 }
 0x19d   : > { %v754_v17 = vpop.f32.mrf.mxu1 }
 0x19f   : > { %v756_v0 = vpop.f32.mrf.mxu1 }
 0x1a2   : > { %v825_v22 = vpop.f32.mrf.mxu0  ;;  %v902_v23 = vpop.f32.mrf.mxu1 }
 0x1a3   : > { %v826_v24 = vadd.f32 %v825_v22, %v671_v12  ;;  %v903_v25 = vadd.f32 %v902_v23, %v748_v13 }
 0x1a4   : > { %v827_v28 = vpop.f32.mrf.mxu0  ;;  %v904_v29 = vpop.f32.mrf.mxu1 }
 0x1a5   : > { %v935_v30 = vadd.f32 %v918_v21, %v826_v24  ;;  %v1942_v31 = vadd.f32 %v926_v11, %v903_v25  ;;  %v828_v32 = vadd.f32 %v827_v28, %v673_v14  ;;  %v905_v37 = vadd.f32 %v904_v29, %v750_v15  ;;  %v1249_v28 = vld [vmem:[%s2050_s6] ss:$0 sm:$0xff] }
 0x1a6   : > { %v831_v33 = vpop.f32.mrf.mxu0  ;;  %v908_v34 = vpop.f32.mrf.mxu1 }
 0x1a7   : > { %v943_v35 = vmul.f32 0.5, %v935_v30  ;;  %v936_v36 = vadd.f32 %v922_v26, %v828_v32  ;;  %v832_v39 = vadd.f32 %v831_v33, %v677_v16  ;;  %v909_v40 = vadd.f32 %v908_v34, %v754_v17  ;;  %v1250_v30 = vld [vmem:[%s2051_s7] ss:$0 sm:$0xff] }
 0x1a8   : > { %v833_v41 = vpop.f32.mrf.mxu0  ;;  %v910_v44 = vpop.f32.mrf.mxu1  ;;  %v938_v47 = vadd.f32 %v930_v38, %v905_v37  ;;  %v945_v25 = vmul.f32 0.5, %v1942_v31 }
 0x1a9   : > { %1353 = vtanh.f32 %v943_v35  ;;  %v944_v42 = vmul.f32 0.5, %v936_v36  ;;  %v834_v43 = vadd.f32 %v833_v41, %v679_v20  ;;  %v939_v45 = vadd.f32 %v918_v21, %v832_v39 }
 0x1aa   : > { %v941_v46 = vadd.f32 %v926_v11, %v909_v40  ;;  %v911_v50 = vadd.f32 %v910_v44, %v756_v0 }
 0x1ab   : > { %1355 = vtanh.f32 %v944_v42  ;;  %v940_v48 = vadd.f32 %v922_v26, %v834_v43  ;;  %v946_v49 = vmul.f32 0.5, %v939_v45 }
 0x1ac   : > { %v942_v52 = vadd.f32 %v930_v38, %v911_v50  ;;  %v948_v27 = vmul.f32 0.5, %v941_v46 }
 0x1ad   : > { %v947_v51 = vmul.f32 0.5, %v940_v48  ;;  %1357 = vtanh.f32 %v946_v49 }
 0x1ae   : > { %1359 = vtanh.f32 %v938_v47 }
 0x1af   : > { %1361 = vtanh.f32 %v947_v51 }
 0x1b0   : > { %1363 = vtanh.f32 %v942_v52 }
 0x1b6   : > { %v1354_v53 = vpop.eup %1353 }
 0x1b7   : > { %v955_v54 = vmul.f32 0.5, %v1354_v53 }
 0x1b8   : > { %v1356_v55 = vpop.eup %1355 }
 0x1b9   : > { %v956_v56 = vmul.f32 0.5, %v1356_v55  ;;  %v961_v57 = vadd.f32 0.5, %v955_v54 }
 0x1ba   : > { %v1358_v59 = vpop.eup %1357 }
 0x1bb   : > { %v962_v60 = vadd.f32 0.5, %v956_v56  ;;  %v1360_v61 = vpop.eup %1359  ;;  %v958_v62 = vmul.f32 0.5, %v1358_v59 }
 0x1bc   : > { %v1362_v63 = vpop.eup %1361  ;;  %v973_v2 = vmul.f32 %v1360_v61, %v961_v57 }
 0x1bd   : > { %v971_v1 = vmul.f32 %v969_v58, %v962_v60  ;;  %v959_v3 = vmul.f32 0.5, %v1362_v63  ;;  %v964_v4 = vadd.f32 0.5, %v958_v62  ;;  %v1364_v8 = vpop.eup %1363 }
 0x1bf   : > { %v975_v5 = vadd.f32 %v973_v2, %v971_v1  ;;  %v965_v7 = vadd.f32 0.5, %v959_v3  ;;  %v974_v10 = vmul.f32 %v1364_v8, %v964_v4 }
 0x1c1   : > { %977 = vadd.xlane.f32.xlu0 %v975_v5  ;;  %v972_v9 = vmul.f32 %v970_v6, %v965_v7 }
 0x1c3   : > { %v976_v11 = vadd.f32 %v974_v10, %v972_v9 }
 0x1c5   : > { %979 = vadd.xlane.f32.xlu0 %v976_v11 }
 0x24a   : > { %v978_v12 = vpop.xlane.xlu0 %977 }
 0x24b   : > { %v981_v13 = vmul.f32 0.0078125, %v978_v12 }
 0x24d   : > { %v983_v14 = vsub.f32 %v975_v5, %v981_v13 }
 0x24e   : > { %v980_v15 = vpop.xlane.xlu0 %979 }
 0x24f   : > { %v985_v16 = vmul.f32 %v983_v14, %v983_v14  ;;  %v982_v17 = vmul.f32 0.0078125, %v980_v15 }
 0x251   : > { %987 = vadd.xlane.f32.xlu1 %v985_v16  ;;  %v984_v18 = vsub.f32 %v976_v11, %v982_v17 }
 0x253   : > { %v986_v0 = vmul.f32 %v984_v18, %v984_v18 }
 0x255   : > { %989 = vadd.xlane.f32.xlu1 %v986_v0 }
 0x2da   : > { %v988_v19 = vpop.xlane.xlu1 %987 }
 0x2db   : > { %v991_v20 = vmul.f32 0.0078125, %v988_v19 }
 0x2dd   : > { %v993_v21 = vadd.f32 1e-05, %v991_v20 }
 0x2de   : > { %v990_v22 = vpop.xlane.xlu1 %989 }
 0x2df   : > { %1365 = vrsqrt.f32 %v993_v21  ;;  %v992_v23 = vmul.f32 0.0078125, %v990_v22 }
 0x2e1   : > { %v994_v24 = vadd.f32 1e-05, %v992_v23 }
 0x2e3   : > { %1367 = vrsqrt.f32 %v994_v24 }
 0x2e4   : > { %1369 = vtanh.f32 %v945_v25 }
 0x2e5   : > { %1371 = vtanh.f32 %v948_v27 }
 0x2ec   : > { %v1366_v26 = vpop.eup %1365 }
 0x2ed   : > { %v997_v29 = vmul.f32 %v1366_v26, %v983_v14 }
 0x2ef   : > { %v1006_v32 = vmul.f32 %v1249_v28, %v997_v29 }
 0x2f0   : > { %v1368_v33 = vpop.eup %1367 }
 0x2f1   : > { %v1015_v34 = vadd.f32 %v1250_v30, %v1006_v32  ;;  %v998_v35 = vmul.f32 %v1368_v33, %v984_v18  ;;  %v1370_v37 = vpop.eup %1369 }
 0x2f3   : > { %1373 = vtanh.f32 %v1015_v34  ;;  %1023 = vst [vmem:[%s467_s25] sm:$0xff] %v1015_v34  ;;  %v1007_v31 = vmul.f32 %v1249_v28, %v998_v35 }
 0x2f5   : > { %v1016_v36 = vadd.f32 %v1250_v30, %v1007_v31 }
 0x2f7   : > { %1375 = vtanh.f32 %v1016_v36  ;;  %1024 = vst [vmem:[%s467_s25 + $0x8] sm:$0xff] %v1016_v36 }
 0x2f8   : > { %1526 = shalt.err (!%p1523_p5)
}
 0x2f9   : > { %s1527_s18 = scalar_lea.hbm %s1962_s17, 256  ;;  %s1531_s12 = scalar_lea.hbm %s2053_s9, 512 }
 0x2fa   : > { %p1528_p12 = scmp.ne.s32.totalorder %s1962_s17, %s1527_s18  ;;  %p1532_p6 = scmp.lt.s32.totalorder %s1962_s17, %s2053_s9 }
 0x2fb   : > { %p1533_p4 = scmp.lt.s32.totalorder %s1531_s12, %s1527_s18 }
 0x2fc   : > { %p1529_p0 = pnand %p1528_p12, %p2103_p7 }
 0x2fd   : > { %p1534_p13 = por %p1533_p4, %p1532_p6 }
 0x2fe   : > { %p1530_p11 = pneg %p1529_p0 }
 0x300   : > { %p1535_p2 = pnand %p1534_p13, %p1530_p11 }
 0x302   : > { %1538 = shalt.err (!%p1535_p2)
}
 0x303   : > { %s1628_s1 = smov 128   ;;  %s1629_s25 = smov 8   ;;  %v957_v38 = vmul.f32 0.5, %v1370_v37  ;;  %v1372_v39 = vpop.eup %1371 }
 0x304   : > { %1279 = dma.vmem_to_hbm [thread:$0]  (%p2103_p7), %s1964_s28, 256, %s1962_s17, %s1031_s16, %s1628_s1, %s1628_s1, %s1629_s25   ;;  %v1374_v41 = vpop.eup %1373  ;;  %v960_v42 = vmul.f32 0.5, %v1372_v39 }
 0x305   : > { %v963_v40 = vadd.f32 0.5, %v957_v38  ;;  %s460_s29 = scalar_lea.vmem [#allocation11], %s1904_s14  ;;  %v1376_v45 = vpop.eup %1375  ;;  %s1998_s19 = scalar_lea.hbm %s2052_s8, %s1262_s3 }
 0x306   : > { %s1044_s15 = sshll.u32 %s460_s29, 4  ;;  %v966_v44 = vadd.f32 0.5, %v960_v42  ;;  %s1026_s28 = scalar_lea.sflag [#allocation4], %s1901_s0  ;;  %s2000_s15 = int_to_ptr.vmem [resolvable:$true] %s1044_s15 }
 0x307   : > { %v1019_v43 = vmul.f32 %v1374_v41, %v963_v40  ;;  %s1539_s17 = scalar_lea.vmem %s2000_s15, 256  ;;  %s1630_s14 = smov [#allocation11]  }
 0x308   : > { %v1020_v46 = vmul.f32 %v1376_v45, %v966_v44  ;;  %p1540_p3 = scmp.ne.s32.totalorder %s2000_s15, %s1539_s17  ;;  %s1543_s16 = sshll.u32 %s1630_s14, 4  ;;  %s1544_s16 = int_to_ptr.vmem [resolvable:$false] %s1543_s16 }
 0x309   : > { %1021 = vst [vmem:[%s460_s29] sm:$0xff] %v1019_v43  ;;  %s1545_s13 = scalar_lea.vmem %s1544_s16, 512  ;;  %p1546_p10 = scmp.lt.s32.totalorder %s2000_s15, %s1544_s16 }
 0x30a   : > { %1022 = vst [vmem:[%s460_s29 + $0x8] sm:$0xff] %v1020_v46  ;;  %p1541_p8 = pnand %p1540_p3, %p2103_p7  ;;  %p1547_p1 = scmp.lt.s32.totalorder %s1545_s13, %s1539_s17 }
 0x30c   : > { %p1542_p9 = pneg %p1541_p8  ;;  %p1548_p5 = por %p1547_p1, %p1546_p10 }
 0x30e   : > { %p1549_p12 = pnand %p1548_p5, %p1542_p9 }
 0x310   : > { %1552 = shalt.err (!%p1549_p12)
}
 0x311   : > { %s1553_s3 = scalar_lea.hbm %s1998_s19, 256  ;;  %s1557_s18 = scalar_lea.hbm %s2052_s8, 512 }
 0x312   : > { %p1554_p0 = scmp.ne.s32.totalorder %s1998_s19, %s1553_s3  ;;  %p1558_p4 = scmp.lt.s32.totalorder %s1998_s19, %s2052_s8 }
 0x313   : > { %p1559_p13 = scmp.lt.s32.totalorder %s1557_s18, %s1553_s3 }
 0x314   : > { %p1555_p11 = pnand %p1554_p0, %p2103_p7 }
 0x315   : > { %p1560_p2 = por %p1559_p13, %p1558_p4 }
 0x316   : > { %p1556_p6 = pneg %p1555_p11 }
 0x318   : > { %p1561_p3 = pnand %p1560_p2, %p1556_p6 }
 0x31a   : > { %1564 = shalt.err (!%p1561_p3)
}
 0x31b   : > { %1278 = dma.vmem_to_hbm [thread:$0]  (%p2103_p7), %s2000_s15, 256, %s1998_s19, %s1026_s28, %s1628_s1, %s1628_s1, %s1629_s25  }
 0x31c PF: > { %s2104_s12 = sld [smem:[#allocation19_spill]] }
 0x31d   : > { %s2105_s26 = sld [smem:[#allocation23_spill]] }
 0x31e   : > { %s2106_s24 = sld [smem:[#allocation20_spill]] }
 0x322   : > { %s1075_s29 = sand.u32 1, %s2104_s12  }
 0x323   : > { %p2107_p8 = scmp.ne.s32.totalorder %s2105_s26, 0  ;;  %s1076_s27 = scalar_lea.sflag [#allocation4], %s1075_s29 }
 0x324   : > { %p2108_p9 = scmp.ge.s32.totalorder %s2106_s24, 2 }
 0x326   : > { %p1300_p10 = pnand %p2108_p9, %p2107_p8 }
 0x328   : > { %p1301_p1 = pneg %p1300_p10 }
 0x32a   : > { %1594 = dma.done.wait (%p1301_p1), %s1076_s27, 256  }
 0x32b   : > { %1596 = vsyncadd (%p1301_p1), %s1076_s27, 4294967040  ;;  %s1085_s23 = scalar_lea.sflag [#allocation13], %s1075_s29 }
 0x32c   : > { %1598 = dma.done.wait (%p1301_p1), %s1085_s23, 256  }
 0x32d   : > { %1600 = vsyncadd (%p1301_p1), %s1085_s23, 4294967040  ;;  %s2109_s12 = sld [smem:[#allocation21_spill]]  ;;  %s2111_s30 = smov %s1607_s10 }
 0x32e   : > { %s2110_s21 = sld [smem:[#allocation22_spill]]  ;;  %s2112_s10 = smov %s1611_s11 }
 0x333   : > { %p30_p7 = scmp.ge.s32.totalorder %s2109_s12, 4  }
 0x334   : > { %s2113_s11 = smov %s2110_s21 }
 0x335   :  { %32 = sbr.rel (!%p30_p7) target bundleno = 14 (0xe), region = 146 }
 0x33a   :  { %1090 = vsyncpa [#allocation3], 1 }
 0x33b   :  { %1092 = vsyncpa [#allocation3 + $0x1], 1 }
 0x33c   :  { %1093 = vsyncpa [#allocation6], 1 }
 0x33d   :  { %1095 = vsyncpa [#allocation6 + $0x1], 1 }
 0x33e   :  { %1096 = vsyncpa [#allocation9], 1 }
 0x33f   :  { %1097 = vsyncpa [#allocation4], 1 }
 0x340   :  { %1099 = vsyncpa [#allocation4 + $0x1], 1 }
 0x341   :  { %1100 = vsyncpa [#allocation13], 1 }
 0x342   :  { %1102 = vsyncpa [#allocation13 + $0x1], 1 }

</bundles_post_ra>
